<compile_context>
chip_gen: v7x
topology: tpu7x:2x2x1
jax: 0.10.0
libtpu: 0.0.40
codegen_flags: <defaults>
</compile_context>

<pallas_src>
import functools

import jax
import jax.numpy as jnp
import numpy as np
from jax import lax
from jax.experimental import pallas as pl
from jax.experimental.pallas import tpu as pltpu

BN_EPS = 1e-5
MID = 64  # hidden conv channels of Conv_Extra


def conv_extra_kernel(x_ref, w1_ref, w2_ref, b2_ref, w3_ref, b3_ref,
                      mask_ref, out_ref, *, W):
    """One group of images per grid step; everything channel-major (C, lanes)."""
    L = x_ref.shape[2]                                         # concat spatial lanes

    x = x_ref[0].astype(jnp.bfloat16)                          # (Cp, L); row C is 1.0 (carries b1)

    # ---- layer 1: 1x1 conv (+BN, +b1 via the ones-row) + ReLU ----------------
    h1 = jnp.dot(w1_ref[...], x, preferred_element_type=jnp.float32)   # (MID, L) f32
    h1 = jnp.maximum(h1, 0.0)

    # ---- layer 2: 3x3 "same" conv as 9 accumulating K=MID matmuls ------------
    # Halo handling: lane rolls of the flattened spatial axis + precomputed zero
    # masks (boundary taps, incl. cross-image leakage, are masked to zero).
    h1b = h1.astype(jnp.bfloat16)
    acc = jnp.dot(w2_ref[4], h1b, preferred_element_type=jnp.float32)  # center tap
    for k in (0, 1, 2, 3, 5, 6, 7, 8):
        dy, dx = k // 3 - 1, k % 3 - 1
        d = dy * W + dx
        shifted = pltpu.roll(h1, shift=(-d) % L, axis=1)                # XLU, f32
        tap = (shifted * mask_ref[k]).astype(jnp.bfloat16)              # VPU, f32 math
        acc = acc + jnp.dot(w2_ref[k], tap, preferred_element_type=jnp.float32)
    h2 = jnp.maximum(acc + b2_ref[...], 0.0)                            # (MID, L) f32

    # ---- layer 3: 1x1 conv + BN (folded); output stays channel-major = NCHW --
    y = jnp.dot(w3_ref[...], h2.astype(jnp.bfloat16),
                preferred_element_type=jnp.float32)                     # (Cp, L)
    out_ref[0] = y + b3_ref[...]


def make_params(channel, key):
    ks = jax.random.split(key, 17)
    f32 = jnp.float32

    def conv_w(k, kh, kw, cin, cout):
        fan_in = kh * kw * cin
        return jax.random.normal(k, (kh, kw, cin, cout), f32) / jnp.sqrt(fan_in)

    def bn(kg, kb, km, kv, c):
        gamma = jax.random.uniform(kg, (c,), f32, 0.5, 1.5)
        beta = 0.1 * jax.random.normal(kb, (c,), f32)
        mean = 0.1 * jax.random.normal(km, (c,), f32)
        var = jax.random.uniform(kv, (c,), f32, 0.5, 1.5)
        scale = gamma / jnp.sqrt(var + BN_EPS)
        shift = beta - mean * scale
        return scale, shift

    p = {}
    p["w1"] = conv_w(ks[0], 1, 1, channel, MID)          # HWIO
    p["b1"] = 0.1 * jax.random.normal(ks[1], (MID,), f32)
    p["s1"], p["t1"] = bn(ks[2], ks[3], ks[4], ks[5], MID)
    p["w2"] = conv_w(ks[6], 3, 3, MID, MID)              # HWIO, no bias
    p["s2"], p["t2"] = bn(ks[7], ks[8], ks[9], ks[10], MID)
    p["w3"] = conv_w(ks[11], 1, 1, MID, channel)         # HWIO
    p["b3"] = 0.1 * jax.random.normal(ks[12], (channel,), f32)
    p["s3"], p["t3"] = bn(ks[13], ks[14], ks[15], ks[16], channel)
    return p


def _pick_images_per_step(n, hw, max_lanes=4096, min_steps=2):
    """Batch images along the lane axis but keep >= 2 grid steps (v7x 2 TCs)."""
    best = 1
    for nb in range(1, n + 1):
        if n % nb:
            continue
        if nb * hw > max_lanes:
            break
        if n // nb < min_steps and nb > 1:
            continue
        best = nb
    return best


def conv_extra_pallas(x_nchw, p):
    N, C, H, W = x_nchw.shape
    HW = H * W
    # pad channels to a sublane multiple, leaving room for the constant-1 row
    # that carries b1 through the layer-1 matmul.
    Cp = ((C + 8) // 8) * 8
    f32, bf16 = jnp.float32, jnp.bfloat16

    s1, t1 = p["s1"], p["t1"]
    s2, t2 = p["s2"], p["t2"]
    s3, t3 = p["s3"], p["t3"]

    # ---- fold BN (and b1) into conv weights / biases; cast weights to bf16 ---
    w1f = (p["w1"].reshape(C, MID) * s1[None, :]).T                     # (MID, C)
    b1f = p["b1"] * s1 + t1                                             # (MID,)
    w1p = (jnp.zeros((MID, Cp), f32).at[:, :C].set(w1f)
           .at[:, C].set(b1f)).astype(bf16)

    w2f = (p["w2"] * s2[None, None, None, :]).reshape(9, MID, MID)      # (tap, I, O)
    w2p = jnp.transpose(w2f, (0, 2, 1)).astype(bf16)                    # (tap, O, I)
    b2f = t2.reshape(MID, 1).astype(f32)

    w3f = (p["w3"].reshape(MID, C) * s3[None, :]).T                     # (C, MID)
    b3f = (p["b3"] * s3 + t3).reshape(C, 1)
    w3p = jnp.zeros((Cp, MID), f32).at[:C, :].set(w3f).astype(bf16)
    b3p = jnp.zeros((Cp, 1), f32).at[:C, :].set(b3f)

    # ---- lane-dense, transpose-free I/O; batch Nb images per grid step -------
    Nb = _pick_images_per_step(N, HW)
    G = N // Nb
    L = Nb * HW

    x3 = jnp.zeros((N, Cp, HW), f32).at[:, :C, :].set(
        x_nchw.reshape(N, C, HW).astype(f32))
    x3 = x3.at[:, C, :].set(1.0)                 # constant row -> layer-1 bias
    x4 = x3.reshape(G, Nb, Cp, HW).transpose(0, 2, 1, 3).reshape(G, Cp, L)

    # zero masks for the 9 taps (static, host-side), tiled per image in a step
    ys, xs = np.divmod(np.arange(HW), W)
    m = np.zeros((9, HW), np.float32)
    for k in range(9):
        dy, dx = k // 3 - 1, k % 3 - 1
        m[k] = ((ys + dy >= 0) & (ys + dy < H) &
                (xs + dx >= 0) & (xs + dx < W)).astype(np.float32)
    masks = jnp.asarray(np.tile(m, (1, Nb)).reshape(9, 1, L))

    args = (x4, w1p, w2p, b2f, w3p, b3p, masks)

    def full_spec(a):
        nd = a.ndim
        return pl.BlockSpec(a.shape, lambda g, nd=nd: (0,) * nd)

    def nbytes(a):
        return int(a.size) * a.dtype.itemsize

    # VMEM limit sized from the actual footprint (+ headroom), not hardcoded.
    vmem_bytes = (sum(nbytes(a) for a in (w1p, w2p, w3p, b2f, b3p, masks))
                  + 2 * 2 * Cp * L * 4            # double-buffered in/out blocks
                  + 6 * MID * L * 4               # live h1 / acc / h2 (+bf16 temps)
                  + (1 << 20))
    vmem_limit = int(min(max(vmem_bytes, 4 << 20), 64 << 20))

    flops = N * 2 * HW * (Cp * MID + 9 * MID * MID + MID * Cp)
    bytes_accessed = sum(nbytes(a) for a in args) + G * Cp * L * 4

    out = pl.pallas_call(
        functools.partial(conv_extra_kernel, W=W),
        out_shape=jax.ShapeDtypeStruct((G, Cp, L), f32),
        grid=(G,),
        in_specs=[
            pl.BlockSpec((1, Cp, L), lambda g: (g, 0, 0)),
            full_spec(w1p), full_spec(w2p), full_spec(b2f),
            full_spec(w3p), full_spec(b3p), full_spec(masks),
        ],
        out_specs=pl.BlockSpec((1, Cp, L), lambda g: (g, 0, 0)),
        compiler_params=pltpu.CompilerParams(
            dimension_semantics=("parallel",),
            vmem_limit_bytes=vmem_limit),
        cost_estimate=pl.CostEstimate(
            flops=flops, transcendentals=0, bytes_accessed=int(bytes_accessed)),
    )(*args)

    y = out.reshape(G, Cp, Nb, HW).transpose(0, 2, 1, 3).reshape(N, Cp, HW)
    return y[:, :C, :].reshape(N, C, H, W)


def conv_extra_reference(x_nchw, p):
    dn = ("NHWC", "HWIO", "NHWC")
    x = jnp.transpose(x_nchw, (0, 2, 3, 1)).astype(jnp.float32)
    h = lax.conv_general_dilated(x, p["w1"], (1, 1), "VALID",
                                 dimension_numbers=dn) + p["b1"]
    h = jnp.maximum(h * p["s1"] + p["t1"], 0.0)
    h = lax.conv_general_dilated(h, p["w2"], (1, 1), ((1, 1), (1, 1)),
                                 dimension_numbers=dn)
    h = jnp.maximum(h * p["s2"] + p["t2"], 0.0)
    h = lax.conv_general_dilated(h, p["w3"], (1, 1), "VALID",
                                 dimension_numbers=dn) + p["b3"]
    h = h * p["s3"] + p["t3"]
    return jnp.transpose(h, (0, 3, 1, 2))


if __name__ == "__main__":
    key = jax.random.PRNGKey(0)
    kx, kp = jax.random.split(key)

    N, C, H, W = 2, 4, 16, 16
    x = jax.random.normal(kx, (N, C, H, W), jnp.float32)
    params = make_params(C, kp)

    out = conv_extra_pallas(x, params)
    out = jax.block_until_ready(out)

    ref = jax.block_until_ready(conv_extra_reference(x, params))
    assert out.shape == (N, C, H, W)
    # bf16 MXU operands with f32 accumulation across 3 conv layers: allow a
    # bf16-scale tolerance vs the pure-f32 reference.
    assert jnp.allclose(out, ref, rtol=3e-2, atol=3e-2), (
        f"max abs err = {jnp.max(jnp.abs(out - ref))}")

    print("KERNEL_OK")
</pallas_src>

<mosaic_0001>
module attributes {stable_mosaic.version = 11 : i64} {
  func.func @conv_extra_kernel(%arg0: i32, %arg1: memref<1x8x256xf32, #tpu.memory_space<vmem>>, %arg2: memref<64x8xbf16, #tpu.memory_space<vmem>>, %arg3: memref<9x64x64xbf16, #tpu.memory_space<vmem>>, %arg4: memref<64x1xf32, #tpu.memory_space<vmem>>, %arg5: memref<8x64xbf16, #tpu.memory_space<vmem>>, %arg6: memref<8x1xf32, #tpu.memory_space<vmem>>, %arg7: memref<9x1x256xf32, #tpu.memory_space<vmem>>, %arg8: memref<1x8x256xf32, #tpu.memory_space<vmem>>) attributes {dimension_semantics = [#tpu.dimension_semantics<parallel>], iteration_bounds = array<i64: 2>, scalar_prefetch = 0 : i64, scratch_operands = 0 : i64, tpu.core_type = #tpu.core_type<tc>, window_params = [{transform_indices = @transform_0, window_bounds = array<i64: 1, 8, 256>}, {pipeline_mode = #tpu.pipeline_mode<synchronous>, transform_indices = @transform_1, window_bounds = array<i64: 64, 8>}, {pipeline_mode = #tpu.pipeline_mode<synchronous>, transform_indices = @transform_2, window_bounds = array<i64: 9, 64, 64>}, {pipeline_mode = #tpu.pipeline_mode<synchronous>, transform_indices = @transform_3, window_bounds = array<i64: 64, 1>}, {pipeline_mode = #tpu.pipeline_mode<synchronous>, transform_indices = @transform_4, window_bounds = array<i64: 8, 64>}, {pipeline_mode = #tpu.pipeline_mode<synchronous>, transform_indices = @transform_5, window_bounds = array<i64: 8, 1>}, {pipeline_mode = #tpu.pipeline_mode<synchronous>, transform_indices = @transform_6, window_bounds = array<i64: 9, 1, 256>}, {transform_indices = @transform_7, window_bounds = array<i64: 1, 8, 256>}]} {
    %c0 = arith.constant 0 : index
    %c0_0 = arith.constant 0 : index
    %c0_1 = arith.constant 0 : index
    %0 = vector.load %arg1[%c0, %c0_0, %c0_1] : memref<1x8x256xf32, #tpu.memory_space<vmem>>, vector<1x8x256xf32>
    %1 = vector.shape_cast %0 : vector<1x8x256xf32> to vector<8x256xf32>
    %2 = arith.truncf %1 : vector<8x256xf32> to vector<8x256xbf16>
    %c0_2 = arith.constant 0 : index
    %c0_3 = arith.constant 0 : index
    %3 = vector.load %arg2[%c0_2, %c0_3] : memref<64x8xbf16, #tpu.memory_space<vmem>>, vector<64x8xbf16>
    %cst = arith.constant dense<0.000000e+00> : vector<64x256xf32>
    %4 = tpu.matmul %3, %2, %cst {dimension_numbers = #tpu.dot_dimension_numbers<[1], [0], [0], [1], [0, 0, 1, 1], [], []>} : vector<64x8xbf16>, vector<8x256xbf16>, vector<64x256xf32> -> vector<64x256xf32>
    %cst_4 = arith.constant 0.000000e+00 : f32
    %5 = vector.broadcast %cst_4 : f32 to vector<64x256xf32>
    %6 = arith.maximumf %4, %5 : vector<64x256xf32>
    %7 = arith.truncf %6 : vector<64x256xf32> to vector<64x256xbf16>
    %c4 = arith.constant 4 : index
    %c0_5 = arith.constant 0 : index
    %c0_6 = arith.constant 0 : index
    %8 = vector.load %arg3[%c4, %c0_5, %c0_6] : memref<9x64x64xbf16, #tpu.memory_space<vmem>>, vector<1x64x64xbf16>
    %9 = vector.shape_cast %8 : vector<1x64x64xbf16> to vector<64x64xbf16>
    %cst_7 = arith.constant dense<0.000000e+00> : vector<64x256xf32>
    %10 = tpu.matmul %9, %7, %cst_7 {dimension_numbers = #tpu.dot_dimension_numbers<[1], [0], [0], [1], [0, 0, 1, 1], [], []>} : vector<64x64xbf16>, vector<64x256xbf16>, vector<64x256xf32> -> vector<64x256xf32>
    %c17_i32 = arith.constant 17 : i32
    %11 = tpu.dynamic_rotate %6 by %c17_i32 dim 1 : vector<64x256xf32>, i32 -> vector<64x256xf32>
    %c0_8 = arith.constant 0 : index
    %c0_9 = arith.constant 0 : index
    %c0_10 = arith.constant 0 : index
    %12 = vector.load %arg7[%c0_8, %c0_9, %c0_10] : memref<9x1x256xf32, #tpu.memory_space<vmem>>, vector<1x1x256xf32>
    %13 = vector.shape_cast %12 : vector<1x1x256xf32> to vector<1x256xf32>
    %14 = vector.broadcast %13 : vector<1x256xf32> to vector<64x256xf32>
    %15 = arith.mulf %11, %14 : vector<64x256xf32>
    %16 = arith.truncf %15 : vector<64x256xf32> to vector<64x256xbf16>
    %c0_11 = arith.constant 0 : index
    %c0_12 = arith.constant 0 : index
    %c0_13 = arith.constant 0 : index
    %17 = vector.load %arg3[%c0_11, %c0_12, %c0_13] : memref<9x64x64xbf16, #tpu.memory_space<vmem>>, vector<1x64x64xbf16>
    %18 = vector.shape_cast %17 : vector<1x64x64xbf16> to vector<64x64xbf16>
    %cst_14 = arith.constant dense<0.000000e+00> : vector<64x256xf32>
    %19 = tpu.matmul %18, %16, %cst_14 {dimension_numbers = #tpu.dot_dimension_numbers<[1], [0], [0], [1], [0, 0, 1, 1], [], []>} : vector<64x64xbf16>, vector<64x256xbf16>, vector<64x256xf32> -> vector<64x256xf32>
    %20 = arith.addf %10, %19 : vector<64x256xf32>
    %c16_i32 = arith.constant 16 : i32
    %21 = tpu.dynamic_rotate %6 by %c16_i32 dim 1 : vector<64x256xf32>, i32 -> vector<64x256xf32>
    %c1 = arith.constant 1 : index
    %c0_15 = arith.constant 0 : index
    %c0_16 = arith.constant 0 : index
    %22 = vector.load %arg7[%c1, %c0_15, %c0_16] : memref<9x1x256xf32, #tpu.memory_space<vmem>>, vector<1x1x256xf32>
    %23 = vector.shape_cast %22 : vector<1x1x256xf32> to vector<1x256xf32>
    %24 = vector.broadcast %23 : vector<1x256xf32> to vector<64x256xf32>
    %25 = arith.mulf %21, %24 : vector<64x256xf32>
    %26 = arith.truncf %25 : vector<64x256xf32> to vector<64x256xbf16>
    %c1_17 = arith.constant 1 : index
    %c0_18 = arith.constant 0 : index
    %c0_19 = arith.constant 0 : index
    %27 = vector.load %arg3[%c1_17, %c0_18, %c0_19] : memref<9x64x64xbf16, #tpu.memory_space<vmem>>, vector<1x64x64xbf16>
    %28 = vector.shape_cast %27 : vector<1x64x64xbf16> to vector<64x64xbf16>
    %cst_20 = arith.constant dense<0.000000e+00> : vector<64x256xf32>
    %29 = tpu.matmul %28, %26, %cst_20 {dimension_numbers = #tpu.dot_dimension_numbers<[1], [0], [0], [1], [0, 0, 1, 1], [], []>} : vector<64x64xbf16>, vector<64x256xbf16>, vector<64x256xf32> -> vector<64x256xf32>
    %30 = arith.addf %20, %29 : vector<64x256xf32>
    %c15_i32 = arith.constant 15 : i32
    %31 = tpu.dynamic_rotate %6 by %c15_i32 dim 1 : vector<64x256xf32>, i32 -> vector<64x256xf32>
    %c2 = arith.constant 2 : index
    %c0_21 = arith.constant 0 : index
    %c0_22 = arith.constant 0 : index
    %32 = vector.load %arg7[%c2, %c0_21, %c0_22] : memref<9x1x256xf32, #tpu.memory_space<vmem>>, vector<1x1x256xf32>
    %33 = vector.shape_cast %32 : vector<1x1x256xf32> to vector<1x256xf32>
    %34 = vector.broadcast %33 : vector<1x256xf32> to vector<64x256xf32>
    %35 = arith.mulf %31, %34 : vector<64x256xf32>
    %36 = arith.truncf %35 : vector<64x256xf32> to vector<64x256xbf16>
    %c2_23 = arith.constant 2 : index
    %c0_24 = arith.constant 0 : index
    %c0_25 = arith.constant 0 : index
    %37 = vector.load %arg3[%c2_23, %c0_24, %c0_25] : memref<9x64x64xbf16, #tpu.memory_space<vmem>>, vector<1x64x64xbf16>
    %38 = vector.shape_cast %37 : vector<1x64x64xbf16> to vector<64x64xbf16>
    %cst_26 = arith.constant dense<0.000000e+00> : vector<64x256xf32>
    %39 = tpu.matmul %38, %36, %cst_26 {dimension_numbers = #tpu.dot_dimension_numbers<[1], [0], [0], [1], [0, 0, 1, 1], [], []>} : vector<64x64xbf16>, vector<64x256xbf16>, vector<64x256xf32> -> vector<64x256xf32>
    %40 = arith.addf %30, %39 : vector<64x256xf32>
    %c1_i32 = arith.constant 1 : i32
    %41 = tpu.dynamic_rotate %6 by %c1_i32 dim 1 : vector<64x256xf32>, i32 -> vector<64x256xf32>
    %c3 = arith.constant 3 : index
    %c0_27 = arith.constant 0 : index
    %c0_28 = arith.constant 0 : index
    %42 = vector.load %arg7[%c3, %c0_27, %c0_28] : memref<9x1x256xf32, #tpu.memory_space<vmem>>, vector<1x1x256xf32>
    %43 = vector.shape_cast %42 : vector<1x1x256xf32> to vector<1x256xf32>
    %44 = vector.broadcast %43 : vector<1x256xf32> to vector<64x256xf32>
    %45 = arith.mulf %41, %44 : vector<64x256xf32>
    %46 = arith.truncf %45 : vector<64x256xf32> to vector<64x256xbf16>
    %c3_29 = arith.constant 3 : index
    %c0_30 = arith.constant 0 : index
    %c0_31 = arith.constant 0 : index
    %47 = vector.load %arg3[%c3_29, %c0_30, %c0_31] : memref<9x64x64xbf16, #tpu.memory_space<vmem>>, vector<1x64x64xbf16>
    %48 = vector.shape_cast %47 : vector<1x64x64xbf16> to vector<64x64xbf16>
    %cst_32 = arith.constant dense<0.000000e+00> : vector<64x256xf32>
    %49 = tpu.matmul %48, %46, %cst_32 {dimension_numbers = #tpu.dot_dimension_numbers<[1], [0], [0], [1], [0, 0, 1, 1], [], []>} : vector<64x64xbf16>, vector<64x256xbf16>, vector<64x256xf32> -> vector<64x256xf32>
    %50 = arith.addf %40, %49 : vector<64x256xf32>
    %c255_i32 = arith.constant 255 : i32
    %51 = tpu.dynamic_rotate %6 by %c255_i32 dim 1 : vector<64x256xf32>, i32 -> vector<64x256xf32>
    %c5 = arith.constant 5 : index
    %c0_33 = arith.constant 0 : index
    %c0_34 = arith.constant 0 : index
    %52 = vector.load %arg7[%c5, %c0_33, %c0_34] : memref<9x1x256xf32, #tpu.memory_space<vmem>>, vector<1x1x256xf32>
    %53 = vector.shape_cast %52 : vector<1x1x256xf32> to vector<1x256xf32>
    %54 = vector.broadcast %53 : vector<1x256xf32> to vector<64x256xf32>
    %55 = arith.mulf %51, %54 : vector<64x256xf32>
    %56 = arith.truncf %55 : vector<64x256xf32> to vector<64x256xbf16>
    %c5_35 = arith.constant 5 : index
    %c0_36 = arith.constant 0 : index
    %c0_37 = arith.constant 0 : index
    %57 = vector.load %arg3[%c5_35, %c0_36, %c0_37] : memref<9x64x64xbf16, #tpu.memory_space<vmem>>, vector<1x64x64xbf16>
    %58 = vector.shape_cast %57 : vector<1x64x64xbf16> to vector<64x64xbf16>
    %cst_38 = arith.constant dense<0.000000e+00> : vector<64x256xf32>
    %59 = tpu.matmul %58, %56, %cst_38 {dimension_numbers = #tpu.dot_dimension_numbers<[1], [0], [0], [1], [0, 0, 1, 1], [], []>} : vector<64x64xbf16>, vector<64x256xbf16>, vector<64x256xf32> -> vector<64x256xf32>
    %60 = arith.addf %50, %59 : vector<64x256xf32>
    %c241_i32 = arith.constant 241 : i32
    %61 = tpu.dynamic_rotate %6 by %c241_i32 dim 1 : vector<64x256xf32>, i32 -> vector<64x256xf32>
    %c6 = arith.constant 6 : index
    %c0_39 = arith.constant 0 : index
    %c0_40 = arith.constant 0 : index
    %62 = vector.load %arg7[%c6, %c0_39, %c0_40] : memref<9x1x256xf32, #tpu.memory_space<vmem>>, vector<1x1x256xf32>
    %63 = vector.shape_cast %62 : vector<1x1x256xf32> to vector<1x256xf32>
    %64 = vector.broadcast %63 : vector<1x256xf32> to vector<64x256xf32>
    %65 = arith.mulf %61, %64 : vector<64x256xf32>
    %66 = arith.truncf %65 : vector<64x256xf32> to vector<64x256xbf16>
    %c6_41 = arith.constant 6 : index
    %c0_42 = arith.constant 0 : index
    %c0_43 = arith.constant 0 : index
    %67 = vector.load %arg3[%c6_41, %c0_42, %c0_43] : memref<9x64x64xbf16, #tpu.memory_space<vmem>>, vector<1x64x64xbf16>
    %68 = vector.shape_cast %67 : vector<1x64x64xbf16> to vector<64x64xbf16>
    %cst_44 = arith.constant dense<0.000000e+00> : vector<64x256xf32>
    %69 = tpu.matmul %68, %66, %cst_44 {dimension_numbers = #tpu.dot_dimension_numbers<[1], [0], [0], [1], [0, 0, 1, 1], [], []>} : vector<64x64xbf16>, vector<64x256xbf16>, vector<64x256xf32> -> vector<64x256xf32>
    %70 = arith.addf %60, %69 : vector<64x256xf32>
    %c240_i32 = arith.constant 240 : i32
    %71 = tpu.dynamic_rotate %6 by %c240_i32 dim 1 : vector<64x256xf32>, i32 -> vector<64x256xf32>
    %c7 = arith.constant 7 : index
    %c0_45 = arith.constant 0 : index
    %c0_46 = arith.constant 0 : index
    %72 = vector.load %arg7[%c7, %c0_45, %c0_46] : memref<9x1x256xf32, #tpu.memory_space<vmem>>, vector<1x1x256xf32>
    %73 = vector.shape_cast %72 : vector<1x1x256xf32> to vector<1x256xf32>
    %74 = vector.broadcast %73 : vector<1x256xf32> to vector<64x256xf32>
    %75 = arith.mulf %71, %74 : vector<64x256xf32>
    %76 = arith.truncf %75 : vector<64x256xf32> to vector<64x256xbf16>
    %c7_47 = arith.constant 7 : index
    %c0_48 = arith.constant 0 : index
    %c0_49 = arith.constant 0 : index
    %77 = vector.load %arg3[%c7_47, %c0_48, %c0_49] : memref<9x64x64xbf16, #tpu.memory_space<vmem>>, vector<1x64x64xbf16>
    %78 = vector.shape_cast %77 : vector<1x64x64xbf16> to vector<64x64xbf16>
    %cst_50 = arith.constant dense<0.000000e+00> : vector<64x256xf32>
    %79 = tpu.matmul %78, %76, %cst_50 {dimension_numbers = #tpu.dot_dimension_numbers<[1], [0], [0], [1], [0, 0, 1, 1], [], []>} : vector<64x64xbf16>, vector<64x256xbf16>, vector<64x256xf32> -> vector<64x256xf32>
    %80 = arith.addf %70, %79 : vector<64x256xf32>
    %c239_i32 = arith.constant 239 : i32
    %81 = tpu.dynamic_rotate %6 by %c239_i32 dim 1 : vector<64x256xf32>, i32 -> vector<64x256xf32>
    %c8 = arith.constant 8 : index
    %c0_51 = arith.constant 0 : index
    %c0_52 = arith.constant 0 : index
    %82 = vector.load %arg7[%c8, %c0_51, %c0_52] : memref<9x1x256xf32, #tpu.memory_space<vmem>>, vector<1x1x256xf32>
    %83 = vector.shape_cast %82 : vector<1x1x256xf32> to vector<1x256xf32>
    %84 = vector.broadcast %83 : vector<1x256xf32> to vector<64x256xf32>
    %85 = arith.mulf %81, %84 : vector<64x256xf32>
    %86 = arith.truncf %85 : vector<64x256xf32> to vector<64x256xbf16>
    %c8_53 = arith.constant 8 : index
    %c0_54 = arith.constant 0 : index
    %c0_55 = arith.constant 0 : index
    %87 = vector.load %arg3[%c8_53, %c0_54, %c0_55] : memref<9x64x64xbf16, #tpu.memory_space<vmem>>, vector<1x64x64xbf16>
    %88 = vector.shape_cast %87 : vector<1x64x64xbf16> to vector<64x64xbf16>
    %cst_56 = arith.constant dense<0.000000e+00> : vector<64x256xf32>
    %89 = tpu.matmul %88, %86, %cst_56 {dimension_numbers = #tpu.dot_dimension_numbers<[1], [0], [0], [1], [0, 0, 1, 1], [], []>} : vector<64x64xbf16>, vector<64x256xbf16>, vector<64x256xf32> -> vector<64x256xf32>
    %90 = arith.addf %80, %89 : vector<64x256xf32>
    %c0_57 = arith.constant 0 : index
    %c0_58 = arith.constant 0 : index
    %91 = vector.load %arg4[%c0_57, %c0_58] : memref<64x1xf32, #tpu.memory_space<vmem>>, vector<64x1xf32>
    %92 = vector.broadcast %91 : vector<64x1xf32> to vector<64x256xf32>
    %93 = arith.addf %90, %92 : vector<64x256xf32>
    %cst_59 = arith.constant 0.000000e+00 : f32
    %94 = vector.broadcast %cst_59 : f32 to vector<64x256xf32>
    %95 = arith.maximumf %93, %94 : vector<64x256xf32>
    %c0_60 = arith.constant 0 : index
    %c0_61 = arith.constant 0 : index
    %96 = vector.load %arg5[%c0_60, %c0_61] : memref<8x64xbf16, #tpu.memory_space<vmem>>, vector<8x64xbf16>
    %97 = arith.truncf %95 : vector<64x256xf32> to vector<64x256xbf16>
    %cst_62 = arith.constant dense<0.000000e+00> : vector<8x256xf32>
    %98 = tpu.matmul %96, %97, %cst_62 {dimension_numbers = #tpu.dot_dimension_numbers<[1], [0], [0], [1], [0, 0, 1, 1], [], []>} : vector<8x64xbf16>, vector<64x256xbf16>, vector<8x256xf32> -> vector<8x256xf32>
    %c0_63 = arith.constant 0 : index
    %c0_64 = arith.constant 0 : index
    %99 = vector.load %arg6[%c0_63, %c0_64] : memref<8x1xf32, #tpu.memory_space<vmem>>, vector<8x1xf32>
    %100 = vector.broadcast %99 : vector<8x1xf32> to vector<8x256xf32>
    %101 = arith.addf %98, %100 : vector<8x256xf32>
    %c0_65 = arith.constant 0 : index
    %c0_66 = arith.constant 0 : index
    %c0_67 = arith.constant 0 : index
    %102 = vector.load %arg8[%c0_65, %c0_66, %c0_67] : memref<1x8x256xf32, #tpu.memory_space<vmem>>, vector<1x8x256xf32>
    %103 = vector.shape_cast %102 : vector<1x8x256xf32> to vector<8x256xf32>
    %104 = vector.shape_cast %101 : vector<8x256xf32> to vector<1x8x256xf32>
    tpu.vector_store %arg8[%c0_65, %c0_66, %c0_67], %104 {strides = array<i32>} : memref<1x8x256xf32, #tpu.memory_space<vmem>>, vector<1x8x256xf32>,
    return
  }
  func.func @transform_0(%arg0: i32) -> (i32, i32, i32) {
    %c0_i32 = arith.constant 0 : i32
    %c0_i32_0 = arith.constant 0 : i32
    %c0_i32_1 = arith.constant 0 : i32
    return %arg0, %c0_i32, %c0_i32_0 : i32, i32, i32
  }
  func.func @transform_1(%arg0: i32) -> (i32, i32) {
    %c0_i32 = arith.constant 0 : i32
    %c0_i32_0 = arith.constant 0 : i32
    %c0_i32_1 = arith.constant 0 : i32
    return %c0_i32, %c0_i32_0 : i32, i32
  }
  func.func @transform_2(%arg0: i32) -> (i32, i32, i32) {
    %c0_i32 = arith.constant 0 : i32
    %c0_i32_0 = arith.constant 0 : i32
    %c0_i32_1 = arith.constant 0 : i32
    %c0_i32_2 = arith.constant 0 : i32
    return %c0_i32, %c0_i32_0, %c0_i32_1 : i32, i32, i32
  }
  func.func @transform_3(%arg0: i32) -> (i32, i32) {
    %c0_i32 = arith.constant 0 : i32
    %c0_i32_0 = arith.constant 0 : i32
    %c0_i32_1 = arith.constant 0 : i32
    return %c0_i32, %c0_i32_0 : i32, i32
  }
  func.func @transform_4(%arg0: i32) -> (i32, i32) {
    %c0_i32 = arith.constant 0 : i32
    %c0_i32_0 = arith.constant 0 : i32
    %c0_i32_1 = arith.constant 0 : i32
    return %c0_i32, %c0_i32_0 : i32, i32
  }
  func.func @transform_5(%arg0: i32) -> (i32, i32) {
    %c0_i32 = arith.constant 0 : i32
    %c0_i32_0 = arith.constant 0 : i32
    %c0_i32_1 = arith.constant 0 : i32
    return %c0_i32, %c0_i32_0 : i32, i32
  }
  func.func @transform_6(%arg0: i32) -> (i32, i32, i32) {
    %c0_i32 = arith.constant 0 : i32
    %c0_i32_0 = arith.constant 0 : i32
    %c0_i32_1 = arith.constant 0 : i32
    %c0_i32_2 = arith.constant 0 : i32
    return %c0_i32, %c0_i32_0, %c0_i32_1 : i32, i32, i32
  }
  func.func @transform_7(%arg0: i32) -> (i32, i32, i32) {
    %c0_i32 = arith.constant 0 : i32
    %c0_i32_0 = arith.constant 0 : i32
    %c0_i32_1 = arith.constant 0 : i32
    return %arg0, %c0_i32, %c0_i32_0 : i32, i32, i32
  }
}

</mosaic_0001>

<bundles_post_ra>
// kernel: tpu_custom_call.1
= control target key start
LH: loop header
LB: loop body
LE: loop exit
PB: predicated region body
PF: predicated region fallthrough
CT: control target
= control target key end

     0   :  { %12 = vsyncpa [#allocation3], 0  ;;  %s4342_s0 = inlined_call_operand.vmem [shape: f32[2,8,256], index: 0, kind: input, shape index: {}]   ;;  %s4343_s1 = inlined_call_operand.vmem [shape: bf16[64,8], index: 1, kind: input, shape index: {}]   ;;  %s4344_s2 = inlined_call_operand.hbm [shape: bf16[9,64,64], index: 2, kind: input, shape index: {}]   ;;  %s4345_s3 = inlined_call_operand.vmem [shape: f32[64,1], index: 3, kind: input, shape index: {}]   ;;  %s4346_s4 = inlined_call_operand.vmem [shape: bf16[8,64], index: 4, kind: input, shape index: {}]   ;;  %s4347_s5 = inlined_call_operand.vmem [shape: f32[8,1], index: 5, kind: input, shape index: {}]   ;;  %s4348_s6 = inlined_call_operand.vmem [shape: f32[9,1,256], index: 6, kind: input, shape index: {}]   ;;  %s4349_s7 = inlined_call_operand.hbm [shape: f32[2,8,256], index: 7, kind: output, shape index: {}]  }
   0x1   :  { %13 = vsyncpa [#allocation4], 0 }
   0x2   :  { %15 = vsyncpa [#allocation4 + $0x1], 0  ;;  %s2981_s24 = smov 0   ;;  %s2983_s25 = smov 0  }
   0x3   :  { %s2985_s26 = smov 0   ;;  %s2987_s27 = smov 0  }
   0x4 LB: > { %s3002_s28 = sadd.s32 4294967295, %s2926_s27   ;;  %s2496_s29 = sadd.s32 4294967294, %s2926_s27   ;;  %s2926_s27 = sphi %s2987_s27, %s4417_s27   ;;  %s2922_s26 = sphi %s2985_s26, %s4416_s26   ;;  %s2918_s25 = sphi %s2983_s25, %s4415_s25   ;;  %s2914_s24 = sphi %s2981_s24, %s4414_s24  }
   0x5   : > { %s3006_s30 = sadd.s32 1, %s2926_s27   ;;  %s180_s8 = sadd.s32 1, %s2922_s26 }
   0x6   : > { %s177_s9 = ssub.s32 %s2926_s27, %s3006_s30  ;;  %p190_p0 = scmp.ne.s32.totalorder %s2922_s26, %s2918_s25 }
   0x7   : > { %p178_p1 = scmp.eq.s32.totalorder %s177_s9, 0  ;;  %p191_p2 = scmp.eq.s32.totalorder %s3002_s28, 1 }
   0x8   : > { %p196_p3 = scmp.ne.s32.totalorder %s2918_s25, %s2914_s24  ;;  %p197_p4 = scmp.eq.s32.totalorder %s2496_s29, 1 }
   0x9   : > { %s3017_s10 = scalar_select %p178_p1, %s2922_s26, %s180_s8  }
   0xa   : > { %p3019_p5 = por %p191_p2, %p190_p0  ;;  %p3023_p6 = por %p197_p4, %p196_p3 }
   0xb   : > { %p2497_p7 = scmp.ge.s32.totalorder %s2926_s27, 1  ;;  %p204_p8 = scmp.lt.s32.totalorder %s2926_s27, 3 }
   0xc   : > { %s4372_s11 = scalar_select %p3019_p5, 1, 0 }
   0xd   : > { %s4373_s12 = scalar_select %p3023_p6, 1, 0 }
   0xe   : > { %p4350_p9 = scmp.eq.s32.totalorder %s3002_s28, 0  ;;  %p3030_p10 = pnand %p2497_p7, %p204_p8 }
   0xf   : > { %s2928_s14 = smov [#allocation2]   ;;  %s2832_s19 = scalar_lea.hbm %s4344_s2, 4608 }
  0x10   : > { %s4374_s13 = scalar_select %p3030_p10, 1, 0 }
  0x11   : > { %s219_s15 = sshll.u32 %s2928_s14, 4  ;;  %p2735_p11 = pneg %p3030_p10  ;;  %s220_s15 = int_to_ptr.vmem [resolvable:$true] %s219_s15 }
  0x12   : > { %p2833_p13 = scmp.ne.s32.totalorder %s4344_s2, %s2832_s19  ;;  %p2839_p3 = scmp.lt.u32.totalorder %s2832_s19, %s4344_s2 }
  0x13   : > { %p3038_p12 = pnand %p4350_p9, %p2735_p11 }
  0x15   : > { %p2834_p0 = pneg %p3038_p12 }
  0x17   : > { %p2835_p1 = pnand %p2834_p0, %p2833_p13 }
  0x19   : > { %p2836_p2 = pneg %p2835_p1 }
  0x1b   : > { %p2841_p4 = pnand %p2839_p3, %p2836_p2 }
  0x1d   : > { %2844 = shalt.err (!%p2841_p4)
}
  0x1e   : > { %s2845_s29 = scalar_lea.vmem %s220_s15, 4608  ;;  %p2853_p9 = scmp.lt.s32.totalorder %s220_s15, %s220_s15 }
  0x1f   : > { %p2846_p7 = scmp.ne.s32.totalorder %s220_s15, %s2845_s29  ;;  %p2854_p6 = scmp.lt.s32.totalorder %s2845_s29, %s2845_s29 }
  0x21   : > { %p2848_p8 = pnand %p2846_p7, %p2834_p0  ;;  %p2855_p5 = por %p2854_p6, %p2853_p9 }
  0x23   : > { %p2849_p11 = pneg %p2848_p8 }
  0x25   : > { %p2856_p10 = pnand %p2855_p5, %p2849_p11 }
  0x27   : > { %2859 = shalt.err (!%p2856_p10)
}
  0x28   : > { %s2929_s8 = smov 64   ;;  %s2930_s9 = smov 4  }
  0x29   : > { %2738 = dma.hbm_to_vmem [thread:$0]  (!%p3038_p12), %s4344_s2, 4608, %s220_s15, [#allocation3], %s2929_s8, %s2929_s8, %s2930_s9  }
  0x2a   : > { %p4376_p13 = scmp.ne.s32.totalorder %s4374_s13, 0 }
  0x2c   : > { %255 = sbr.rel (%p4376_p13) target bundleno = 1138 (0x472), region = 48 }
  0x33   : > { %p4377_p1 = scmp.eq.s32.totalorder %s3002_s28, 0 }
  0x35   : > { %2905 = dma.done.wait (%p4377_p1), [#allocation3], 4608   ;;  %p4378_p0 = pmov %p4377_p1 }
  0x36   : > { %p287_p5 = scmp.lt.s32.totalorder %s3002_s28, 1  ;;  %v4353_v0 = vmov 0   ;;  %vm338_vm0 = vcmask 1043456   ;;  %v2792_v6 = vld [vmem:[%s4343_s1] sm:$0xff]   ;;  %vm325_vm1 = vcmask 64512   ;;  %v2793_v7 = vld [vmem:[%s4343_s1 + $0x8] sm:$0xff]   ;;  %v483_v51 = vlaneseq }
  0x37   : > { %2907 = vsyncadd (%p4378_p0), [#allocation3], 4294962688  ;;  %377 = vmatprep.mubr.bf16.mxu0 %v4353_v0  ;;  %1348 = vmatprep.mubr.bf16.mxu1 %v4353_v0  ;;  %v2794_v8 = vld [vmem:[%s4343_s1 + $0x10] sm:$0xff]   ;;  %v2795_v9 = vld [vmem:[%s4343_s1 + $0x18] sm:$0xff]   ;;  %s2932_s17 = smov 1   ;;  %s2935_s15 = smov 113  }
  0x38   : > { %s288_s16 = scalar_select %p287_p5, %s3002_s28, 1  ;;  %2791 = vset.pattern.permute.xlu1 %v4353_v0  ;;  %2790 = vset.pattern.permute.xlu0 %v4353_v0  ;;  %v505_v55 = vshrl.u32 %v483_v51, 7  ;;  %v3285_v56 = vand.u32 127, %v483_v51  ;;  %v502_v57 = vld [vmem:[%s4348_s6] sm:$0x3]  ;;  %vm566_vm7 = vcmask 523264  }
  0x39   : > { %s2936_s18 = smov 16   ;;  %s2938_s29 = smov 15  }
  0x3a   : > { %s2599_s13 = sshll.u32 %s288_s16, 4  ;;  %s2933_s16 = smov 17   ;;  %vm485_vm2 = vcmp.lt.s32.totalorder %v3285_v56, 17  ;;  %v3293_v59 = vsub.s32 0, %v505_v55  ;;  %v3295_v60 = vsub.s32 1, %v505_v55  ;;  %vm1221_vm3 = vcmp.lt.s32.totalorder %v3285_v56, 1 }
  0x3b   : > { %s291_s19 = scalar_lea.vmem %s4342_s0, %s2599_s13  ;;  %s2934_s13 = smov 127   ;;  %vm1653_vm4 = vcmp.lt.s32.totalorder %v3285_v56, 113  ;;  %vm1437_vm5 = vcmp.lt.s32.totalorder %v3285_v56, 127  ;;  %vm1869_vm6 = vcmp.lt.s32.totalorder %v3285_v56, 112  ;;  %vm789_vm8 = vcmp.lt.s32.totalorder %v3285_v56, 16 }
  0x3c   : > { %v294_v1 = vld [vmem:[%s291_s19 + $0x8] sm:$0xff]  ;;  %v293_v2 = vld [vmem:[%s291_s19] sm:$0xff]  ;;  %s2937_s19 = smov 112   ;;  %4383 = vst [vmem:[#allocation12_spill] sm:$0xff] %v3293_v59  ;;  %4384 = vst [vmem:[#allocation13_spill] sm:$0xff] %v3295_v60  ;;  %v3300_v62 = vrot.slane %v502_v57, %v3293_v59  ;;  %v3303_v63 = vrot.slane %v502_v57, %v3295_v60  ;;  %s2939_s8 = smov 111  }
  0x3d   : > { %v296_v3 = vpack.c.bf16 %v294_v1, %v294_v1  ;;  %v295_v4 = vpack.c.bf16 %v293_v2, %v293_v2  ;;  %vm1005_vm9 = vcmp.lt.s32.totalorder %v3285_v56, 15  ;;  %vm2085_vm10 = vcmp.lt.s32.totalorder %v3285_v56, 111  ;;  %v2826_v56 = vld [vmem:[#allocation2 + $0x48] sm:$0xff]   ;;  %p4412_p9 = scmp.ne.s32.totalorder %s4372_s11, 0 }
  0x3f   : > { %2509 = vmatprep.subr.msk.bf16.mxu0 %vm338_vm0, %v296_v3  ;;  %v340_v5 = vsel %vm338_vm0, %v295_v4, 0 }
  0x40   : > { %346 = vmatpush1.bf16.msra.mxu0 %v340_v5 }
  0x43   : > { %2510 = vmatmul.mubr.msk.bf16.vlgmr.msra.gmra.mrb[0].mxu0 %vm325_vm1, %v2792_v6 }
  0x44   : > { %387 = vmatprep.mubr.bf16.mxu0 %v4353_v0 }
  0x4b   : > { %2511 = vmatmul.mubr.msk.bf16.gmra.mrb[4].mxu0 %vm325_vm1, %v2793_v7 }
  0x4c   : > { %397 = vmatprep.mubr.bf16.mxu0 %v4353_v0 }
  0x53   : > { %2512 = vmatmul.mubr.msk.bf16.gmra.mrb[8].mxu0 %vm325_vm1, %v2794_v8 }
  0x54   : > { %407 = vmatprep.mubr.bf16.mxu0 %v4353_v0 }
  0x5b   : > { %2513 = vmatmul.mubr.msk.bf16.gmra.mrb[12].mxu0 %vm325_vm1, %v2795_v9 }
  0x5c   : > { %611 = vmatprep.mubr.bf16.mxu0 %v4353_v0 }
 0x116   : > { %v379_v10 = vpop.f32.mrb[0].mxu0 }
 0x117   : > { %v3089_v11 = vmax.f32 %v379_v10, 0.0  ;;  %v381_v12 = vpop.f32.mrb[1].mxu0 }
 0x118   : > { %v3091_v13 = vmax.f32 %v381_v12, 0.0  ;;  %v383_v14 = vpop.f32.mrb[2].mxu0 }
 0x119   : > { %1189 = vrot.lane.b32.xlu0 %v3089_v11, %s2932_s17  ;;  %v385_v15 = vpop.f32.mrb[3].mxu0  ;;  %v3097_v16 = vmax.f32 %v383_v14, 0.0 }
 0x11a   : > { %1205 = vrot.lane.b32.xlu1 %v3091_v13, %s2932_s17  ;;  %v3121_v27 = vmax.f32 %v385_v15, 0.0 }
 0x11d   : > { %451 = vrot.lane.b32.xlu0 %v3089_v11, %s2933_s16 }
 0x11e   : > { %453 = vrot.lane.b32.xlu1 %v3097_v16, %s2933_s16  ;;  %v389_v17 = vpop.f32.mrb[4].mxu0 }
 0x11f   : > { %v391_v18 = vpop.f32.mrb[5].mxu0  ;;  %v3141_v30 = vmax.f32 %v389_v17, 0.0 }
 0x120   : > { %v393_v19 = vpop.f32.mrb[6].mxu0  ;;  %v3165_v32 = vmax.f32 %v391_v18, 0.0  ;;  %v2548_v18 = vld [vmem:[%s4348_s6 + $0x6] sm:$0x3] }
 0x121   : > { %1405 = vrot.lane.b32.xlu0 %v3089_v11, %s2934_s13  ;;  %v395_v20 = vpop.f32.mrb[7].mxu0  ;;  %v3147_v31 = vmax.f32 %v393_v19, 0.0 }
 0x122   : > { %1407 = vrot.lane.b32.xlu1 %v3097_v16, %s2934_s13  ;;  %v3167_v33 = vmax.f32 %v395_v20, 0.0 }
 0x125   : > { %1621 = vrot.lane.b32.xlu0 %v3089_v11, %s2935_s15 }
 0x126   : > { %1623 = vrot.lane.b32.xlu1 %v3097_v16, %s2935_s15  ;;  %v399_v21 = vpop.f32.mrb[8].mxu0 }
 0x127   : > { %v401_v22 = vpop.f32.mrb[9].mxu0  ;;  %v3181_v34 = vmax.f32 %v399_v21, 0.0  ;;  %v3344_v21 = vrot.slane %v2548_v18, %v3295_v60 }
 0x128   : > { %v403_v23 = vpop.f32.mrb[10].mxu0  ;;  %v3205_v36 = vmax.f32 %v401_v22, 0.0  ;;  %v3347_v22 = vrot.slane %v2548_v18, %v3293_v59 }
 0x129   : > { %757 = vrot.lane.b32.xlu0 %v3089_v11, %s2936_s18  ;;  %v405_v24 = vpop.f32.mrb[11].mxu0  ;;  %4379 = vst [vmem:[#allocation8_spill] sm:$0xff] %v3181_v34  ;;  %v3187_v35 = vmax.f32 %v403_v23, 0.0 }
 0x12a   : > { %759 = vrot.lane.b32.xlu1 %v3097_v16, %s2936_s18  ;;  %v3207_v37 = vmax.f32 %v405_v24, 0.0 }
 0x12b   : > { %4380 = vst [vmem:[#allocation9_spill] sm:$0xff] %v3187_v35 }
 0x12d   : > { %1837 = vrot.lane.b32.xlu0 %v3089_v11, %s2937_s19 }
 0x12e   : > { %1839 = vrot.lane.b32.xlu1 %v3097_v16, %s2937_s19  ;;  %v409_v25 = vpop.f32.mrb[12].mxu0 }
 0x12f   : > { %v3119_v26 = vpop.f32.mrb[13].mxu0  ;;  %v3221_v38 = vmax.f32 %v409_v25, 0.0 }
 0x130   : > { %v413_v28 = vpop.f32.mrb[14].mxu0  ;;  %v3250_v44 = vmax.f32 %v3119_v26, 0.0 }
 0x131   : > { %467 = vrot.lane.b32.xlu0 %v3091_v13, %s2933_s16  ;;  %v3125_v29 = vpop.f32.mrb[15].mxu0  ;;  %v3227_v39 = vmax.f32 %v413_v28, 0.0 }
 0x132   : > { %1207 = vrot.lane.b32.xlu1 %v3121_v27, %s2932_s17  ;;  %v3255_v46 = vmax.f32 %v3125_v29, 0.0 }
 0x135   : > { %1421 = vrot.lane.b32.xlu0 %v3091_v13, %s2934_s13 }
 0x136   : > { %469 = vrot.lane.b32.xlu1 %v3121_v27, %s2933_s16 }
 0x139   : > { %1637 = vrot.lane.b32.xlu0 %v3091_v13, %s2935_s15 }
 0x13a   : > { %1423 = vrot.lane.b32.xlu1 %v3121_v27, %s2934_s13 }
 0x13d   : > { %773 = vrot.lane.b32.xlu0 %v3091_v13, %s2936_s18 }
 0x13e   : > { %1639 = vrot.lane.b32.xlu1 %v3121_v27, %s2935_s15 }
 0x141   : > { %1191 = vrot.lane.b32.xlu0 %v3097_v16, %s2932_s17 }
 0x142   : > { %775 = vrot.lane.b32.xlu1 %v3121_v27, %s2936_s18 }
 0x145   : > { %1193 = vrot.lane.b32.xlu0 %v3141_v30, %s2932_s17 }
 0x146   : > { %1195 = vrot.lane.b32.xlu1 %v3147_v31, %s2932_s17 }
 0x149   : > { %455 = vrot.lane.b32.xlu0 %v3141_v30, %s2933_s16 }
 0x14a   : > { %457 = vrot.lane.b32.xlu1 %v3147_v31, %s2933_s16 }
 0x14d   : > { %1409 = vrot.lane.b32.xlu0 %v3141_v30, %s2934_s13 }
 0x14e   : > { %1411 = vrot.lane.b32.xlu1 %v3147_v31, %s2934_s13 }
 0x151   : > { %1625 = vrot.lane.b32.xlu0 %v3141_v30, %s2935_s15 }
 0x152   : > { %1627 = vrot.lane.b32.xlu1 %v3147_v31, %s2935_s15 }
 0x155   : > { %1209 = vrot.lane.b32.xlu0 %v3165_v32, %s2932_s17 }
 0x156   : > { %1211 = vrot.lane.b32.xlu1 %v3167_v33, %s2932_s17 }
 0x159   : > { %471 = vrot.lane.b32.xlu0 %v3165_v32, %s2933_s16 }
 0x15a   : > { %473 = vrot.lane.b32.xlu1 %v3167_v33, %s2933_s16 }
 0x15d   : > { %1425 = vrot.lane.b32.xlu0 %v3165_v32, %s2934_s13 }
 0x15e   : > { %1427 = vrot.lane.b32.xlu1 %v3167_v33, %s2934_s13 }
 0x161   : > { %1641 = vrot.lane.b32.xlu0 %v3165_v32, %s2935_s15 }
 0x162   : > { %1643 = vrot.lane.b32.xlu1 %v3167_v33, %s2935_s15 }
 0x165   : > { %1197 = vrot.lane.b32.xlu0 %v3181_v34, %s2932_s17 }
 0x166   : > { %1199 = vrot.lane.b32.xlu1 %v3187_v35, %s2932_s17 }
 0x169   : > { %459 = vrot.lane.b32.xlu0 %v3181_v34, %s2933_s16 }
 0x16a   : > { %461 = vrot.lane.b32.xlu1 %v3187_v35, %s2933_s16 }
 0x16d   : > { %1413 = vrot.lane.b32.xlu0 %v3181_v34, %s2934_s13 }
 0x16e   : > { %1415 = vrot.lane.b32.xlu1 %v3187_v35, %s2934_s13 }
 0x171   : > { %1629 = vrot.lane.b32.xlu0 %v3181_v34, %s2935_s15 }
 0x172   : > { %1631 = vrot.lane.b32.xlu1 %v3187_v35, %s2935_s15 }
 0x175   : > { %1213 = vrot.lane.b32.xlu0 %v3205_v36, %s2932_s17 }
 0x176   : > { %1215 = vrot.lane.b32.xlu1 %v3207_v37, %s2932_s17 }
 0x179   : > { %475 = vrot.lane.b32.xlu0 %v3205_v36, %s2933_s16 }
 0x17a   : > { %477 = vrot.lane.b32.xlu1 %v3207_v37, %s2933_s16 }
 0x17d   : > { %1429 = vrot.lane.b32.xlu0 %v3205_v36, %s2934_s13 }
 0x17e   : > { %1431 = vrot.lane.b32.xlu1 %v3207_v37, %s2934_s13 }
 0x181   : > { %1645 = vrot.lane.b32.xlu0 %v3205_v36, %s2935_s15 }
 0x182   : > { %1647 = vrot.lane.b32.xlu1 %v3207_v37, %s2935_s15 }
 0x185   : > { %1201 = vrot.lane.b32.xlu0 %v3221_v38, %s2932_s17 }
 0x186   : > { %1203 = vrot.lane.b32.xlu1 %v3227_v39, %s2932_s17 }
 0x189   : > { %463 = vrot.lane.b32.xlu0 %v3221_v38, %s2933_s16 }
 0x18a   : > { %465 = vrot.lane.b32.xlu1 %v3227_v39, %s2933_s16 }
 0x18b   : > { %v3237_v40 = vpop.permute.xlu0 %1189 }
 0x18c   : > { %v3239_v41 = vpop.permute.xlu1 %1205 }
 0x18d   : > { %1417 = vrot.lane.b32.xlu0 %v3221_v38, %s2934_s13  ;;  %v1230_v23 = vsel %vm1221_vm3, %v3239_v41, %v3237_v40  ;;  %v1222_v24 = vsel %vm1221_vm3, %v3237_v40, %v3239_v41 }
 0x18e   : > { %1419 = vrot.lane.b32.xlu1 %v3227_v39, %s2934_s13  ;;  %v1251_v51 = vmul.f32 %v3347_v22, %v1230_v23 }
 0x18f   : > { %v452_v42 = vpop.permute.xlu0 %451 }
 0x190   : > { %v454_v43 = vpop.permute.xlu1 %453 }
 0x191   : > { %1633 = vrot.lane.b32.xlu0 %v3221_v38, %s2935_s15 }
 0x192   : > { %1635 = vrot.lane.b32.xlu1 %v3227_v39, %s2935_s15 }
 0x193   : > { %v3252_v45 = vpop.permute.xlu0 %1405 }
 0x194   : > { %v3257_v47 = vpop.permute.xlu1 %1407 }
 0x195   : > { %1217 = vrot.lane.b32.xlu0 %v3250_v44, %s2932_s17 }
 0x196   : > { %1219 = vrot.lane.b32.xlu1 %v3255_v46, %s2932_s17 }
 0x197   : > { %v3263_v48 = vpop.permute.xlu0 %1621 }
 0x198   : > { %v3265_v49 = vpop.permute.xlu1 %1623 }
 0x199   : > { %1853 = vrot.lane.b32.xlu0 %v3091_v13, %s2937_s19 }
 0x19a   : > { %1855 = vrot.lane.b32.xlu1 %v3121_v27, %s2937_s19 }
 0x19b   : > { %v3271_v50 = vpop.permute.xlu0 %757 }
 0x19c   : > { %4381 = vst [vmem:[#allocation10_spill] sm:$0xff] %v3271_v50  ;;  %v3273_v52 = vpop.permute.xlu1 %759 }
 0x19d   : > { %4382 = vst [vmem:[#allocation11_spill] sm:$0xff] %v3273_v52  ;;  %479 = vrot.lane.b32.xlu0 %v3250_v44, %s2933_s16 }
 0x19e   : > { %763 = vrot.lane.b32.xlu1 %v3147_v31, %s2936_s18 }
 0x19f   : > { %v3279_v53 = vpop.permute.xlu0 %1837 }
 0x1a0   : > { %v3281_v54 = vpop.permute.xlu1 %1839 }
 0x1a1   : > { %1433 = vrot.lane.b32.xlu0 %v3250_v44, %s2934_s13 }
 0x1a2   : > { %779 = vrot.lane.b32.xlu1 %v3167_v33, %s2936_s18 }
 0x1a3   : > { %v468_v58 = vpop.permute.xlu0 %467 }
 0x1a4   : > { %v1208_v61 = vpop.permute.xlu1 %1207  ;;  %v486_v1 = vsel %vm485_vm2, %v452_v42, %v468_v58  ;;  %v494_v2 = vsel %vm485_vm2, %v468_v58, %v452_v42  ;;  %v1252_v42 = vmul.f32 %v3344_v21, %v1222_v24 }
 0x1a5   : > { %1649 = vrot.lane.b32.xlu0 %v3250_v44, %s2935_s15  ;;  %v514_v7 = vmul.f32 %v3300_v62, %v494_v2  ;;  %v515_v8 = vmul.f32 %v3303_v63, %v486_v1 }
 0x1a6   : > { %1843 = vrot.lane.b32.xlu1 %v3147_v31, %s2937_s19 }
 0x1a7   : > { %v3311_v3 = vpop.permute.xlu0 %1421 }
 0x1a8   : > { %v470_v4 = vpop.permute.xlu1 %469 }
 0x1a9   : > { %v487_v5 = vsel %vm485_vm2, %v454_v43, %v470_v4  ;;  %v495_v6 = vsel %vm485_vm2, %v470_v4, %v454_v43  ;;  %761 = vrot.lane.b32.xlu0 %v3141_v30, %s2936_s18 }
 0x1aa   : > { %v516_v9 = vmul.f32 %v3300_v62, %v495_v6  ;;  %v517_v10 = vmul.f32 %v3303_v63, %v487_v5  ;;  %1859 = vrot.lane.b32.xlu1 %v3167_v33, %s2937_s19 }
 0x1ab   : > { %v3325_v12 = vpop.permute.xlu0 %1637 }
 0x1ac   : > { %v530_v14 = vpack.c.bf16 %v516_v9, %v514_v7  ;;  %v3327_v15 = vpop.permute.xlu1 %1423  ;;  %v531_v17 = vpack.c.bf16 %v517_v10, %v515_v8 }
 0x1ad   : > { %777 = vrot.lane.b32.xlu0 %v3165_v32, %s2936_s18 }
 0x1ae   : > { %579 = vmatprep.subr.bf16.mxu0 %v531_v17  ;;  %767 = vrot.lane.b32.xlu1 %v3187_v35, %s2936_s18 }
 0x1af   : > { %v3337_v19 = vpop.permute.xlu0 %773  ;;  %580 = vmatpush1.bf16.msra.mxu0 %v530_v14 }
 0x1b0   : > { %4385 = vst [vmem:[#allocation14_spill] sm:$0xff] %v3337_v19  ;;  %v3339_v20 = vpop.permute.xlu1 %1639 }
 0x1b1   : > { %1841 = vrot.lane.b32.xlu0 %v3141_v30, %s2937_s19 }
 0x1b2   : > { %481 = vrot.lane.b32.xlu1 %v3255_v46, %s2933_s16 }
 0x1b3   : > { %v1192_v25 = vpop.permute.xlu0 %1191 }
 0x1b4   : > { %v1231_v26 = vsel %vm1221_vm3, %v1208_v61, %v1192_v25  ;;  %v3361_v28 = vpop.permute.xlu1 %775  ;;  %v1223_v29 = vsel %vm1221_vm3, %v1192_v25, %v1208_v61 }
 0x1b5   : > { %4386 = vst [vmem:[#allocation15_spill] sm:$0xff] %v3361_v28  ;;  %1857 = vrot.lane.b32.xlu0 %v3165_v32, %s2937_s19  ;;  %v1254_v43 = vmul.f32 %v3344_v21, %v1223_v29  ;;  %v1253_v40 = vmul.f32 %v3347_v22, %v1231_v26 }
 0x1b6   : > { %1435 = vrot.lane.b32.xlu1 %v3255_v46, %s2934_s13  ;;  %s284_s13 = sand.u32 1, %s2918_s25  }
 0x1b7   : > { %v1194_v41 = vpop.permute.xlu0 %1193  ;;  %v1268_v55 = vpack.c.bf16 %v1254_v43, %v1252_v42  ;;  %v1267_v57 = vpack.c.bf16 %v1253_v40, %v1251_v51 }
 0x1b8   : > { %v1196_v58 = vpop.permute.xlu1 %1195 }
 0x1b9   : > { %1316 = vmatprep.subr.bf16.mxu1 %v1268_v55  ;;  %765 = vrot.lane.b32.xlu0 %v3181_v34, %s2936_s18 }
 0x1ba   : > { %1317 = vmatpush1.bf16.msra.mxu1 %v1267_v57  ;;  %783 = vrot.lane.b32.xlu1 %v3207_v37, %s2936_s18 }
 0x1bb   : > { %v456_v61 = vpop.permute.xlu0 %455 }
 0x1bc   : > { %v458_v1 = vpop.permute.xlu1 %457 }
 0x1bd   : > { %781 = vrot.lane.b32.xlu0 %v3205_v36, %s2936_s18 }
 0x1be   : > { %1847 = vrot.lane.b32.xlu1 %v3187_v35, %s2937_s19 }
 0x1bf   : > { %v3381_v2 = vpop.permute.xlu0 %1409 }
 0x1c0   : > { %v3383_v4 = vpop.permute.xlu1 %1411 }
 0x1c1   : > { %1845 = vrot.lane.b32.xlu0 %v3181_v34, %s2937_s19 }
 0x1c2   : > { %1863 = vrot.lane.b32.xlu1 %v3207_v37, %s2937_s19 }
 0x1c3   : > { %v3389_v5 = vpop.permute.xlu0 %1625 }
 0x1c4   : > { %v3391_v6 = vpop.permute.xlu1 %1627 }
 0x1c5   : > { %1861 = vrot.lane.b32.xlu0 %v3205_v36, %s2937_s19 }
 0x1c6   : > { %771 = vrot.lane.b32.xlu1 %v3227_v39, %s2936_s18 }
 0x1c7   : > { %v1210_v7 = vpop.permute.xlu0 %1209 }
 0x1c8   : > { %v1224_v8 = vsel %vm1221_vm3, %v1194_v41, %v1210_v7  ;;  %v1232_v9 = vsel %vm1221_vm3, %v1210_v7, %v1194_v41  ;;  %v1212_v10 = vpop.permute.xlu1 %1211 }
 0x1c9   : > { %v1255_v14 = vmul.f32 %v3347_v22, %v1232_v9  ;;  %v1256_v17 = vmul.f32 %v3344_v21, %v1224_v8  ;;  %v1225_v18 = vsel %vm1221_vm3, %v1196_v58, %v1212_v10  ;;  %v1233_v23 = vsel %vm1221_vm3, %v1212_v10, %v1196_v58  ;;  %769 = vrot.lane.b32.xlu0 %v3221_v38, %s2936_s18 }
 0x1ca   : > { %v1257_v24 = vmul.f32 %v3347_v22, %v1233_v23  ;;  %v1258_v25 = vmul.f32 %v3344_v21, %v1225_v18  ;;  %1851 = vrot.lane.b32.xlu1 %v3227_v39, %s2937_s19 }
 0x1cb   : > { %v472_v26 = vpop.permute.xlu0 %471 }
 0x1cc   : > { %v488_v29 = vsel %vm485_vm2, %v456_v61, %v472_v26  ;;  %v496_v42 = vsel %vm485_vm2, %v472_v26, %v456_v61  ;;  %v474_v43 = vpop.permute.xlu1 %473  ;;  %v1270_v51 = vpack.c.bf16 %v1258_v25, %v1256_v17  ;;  %v1269_v40 = vpack.c.bf16 %v1257_v24, %v1255_v14 }
 0x1cd   : > { %v518_v41 = vmul.f32 %v3300_v62, %v496_v42  ;;  %v519_v55 = vmul.f32 %v3303_v63, %v488_v29  ;;  %v489_v57 = vsel %vm485_vm2, %v458_v1, %v474_v43  ;;  %v497_v58 = vsel %vm485_vm2, %v474_v43, %v458_v1  ;;  %785 = vrot.lane.b32.xlu0 %v3250_v44, %s2936_s18 }
 0x1ce   : > { %v520_v7 = vmul.f32 %v3300_v62, %v497_v58  ;;  %v521_v61 = vmul.f32 %v3303_v63, %v489_v57  ;;  %1318 = vmatprep.subr.bf16.mxu1 %v1270_v51  ;;  %975 = vrot.lane.b32.xlu1 %v3097_v16, %s2938_s29 }
 0x1cf   : > { %v3429_v8 = vpop.permute.xlu0 %1425  ;;  %1319 = vmatpush1.bf16.msra.mxu1 %v1269_v40 }
 0x1d0   : > { %v532_v9 = vpack.c.bf16 %v520_v7, %v518_v41  ;;  %v3431_v10 = vpop.permute.xlu1 %1427  ;;  %v533_v14 = vpack.c.bf16 %v521_v61, %v519_v55 }
 0x1d1   : > { %1849 = vrot.lane.b32.xlu0 %v3221_v38, %s2937_s19 }
 0x1d2   : > { %581 = vmatprep.subr.bf16.mxu0 %v533_v14  ;;  %991 = vrot.lane.b32.xlu1 %v3121_v27, %s2938_s29 }
 0x1d3   : > { %v3437_v1 = vpop.permute.xlu0 %1641  ;;  %582 = vmatpush1.bf16.msra.mxu0 %v532_v9 }
 0x1d4   : > { %v3439_v17 = vpop.permute.xlu1 %1643 }
 0x1d5   : > { %1865 = vrot.lane.b32.xlu0 %v3250_v44, %s2937_s19 }
 0x1d6   : > { %1651 = vrot.lane.b32.xlu1 %v3255_v46, %s2935_s15  ;;  %s2502_s15 = sshll.u32 %s284_s13, 4 }
 0x1d7   : > { %v1198_v18 = vpop.permute.xlu0 %1197 }
 0x1d8   : > { %v1200_v23 = vpop.permute.xlu1 %1199 }
 0x1d9   : > { %973 = vrot.lane.b32.xlu0 %v3089_v11, %s2938_s29 }
 0x1da   : > { %2055 = vrot.lane.b32.xlu1 %v3097_v16, %s2939_s8 }
 0x1db   : > { %v460_v24 = vpop.permute.xlu0 %459 }
 0x1dc   : > { %v462_v25 = vpop.permute.xlu1 %461 }
 0x1dd   : > { %989 = vrot.lane.b32.xlu0 %v3091_v13, %s2938_s29 }
 0x1de   : > { %2071 = vrot.lane.b32.xlu1 %v3121_v27, %s2939_s8 }
 0x1df   : > { %v3453_v26 = vpop.permute.xlu0 %1413 }
 0x1e0   : > { %v3455_v29 = vpop.permute.xlu1 %1415 }
 0x1e1   : > { %2053 = vrot.lane.b32.xlu0 %v3089_v11, %s2939_s8 }
 0x1e2   : > { %979 = vrot.lane.b32.xlu1 %v3147_v31, %s2938_s29 }
 0x1e3   : > { %v1630_v42 = vpop.permute.xlu0 %1629 }
 0x1e4   : > { %v1632_v43 = vpop.permute.xlu1 %1631 }
 0x1e5   : > { %2069 = vrot.lane.b32.xlu0 %v3091_v13, %s2939_s8 }
 0x1e6   : > { %995 = vrot.lane.b32.xlu1 %v3167_v33, %s2938_s29 }
 0x1e7   : > { %v1214_v51 = vpop.permute.xlu0 %1213 }
 0x1e8   : > { %v1226_v40 = vsel %vm1221_vm3, %v1198_v18, %v1214_v51  ;;  %v1234_v41 = vsel %vm1221_vm3, %v1214_v51, %v1198_v18  ;;  %v1216_v55 = vpop.permute.xlu1 %1215 }
 0x1e9   : > { %v1259_v57 = vmul.f32 %v3347_v22, %v1234_v41  ;;  %v1260_v58 = vmul.f32 %v3344_v21, %v1226_v40  ;;  %v1227_v7 = vsel %vm1221_vm3, %v1200_v23, %v1216_v55  ;;  %v1235_v61 = vsel %vm1221_vm3, %v1216_v55, %v1200_v23  ;;  %977 = vrot.lane.b32.xlu0 %v3141_v30, %s2938_s29 }
 0x1ea   : > { %v1261_v9 = vmul.f32 %v3347_v22, %v1235_v61  ;;  %v1262_v14 = vmul.f32 %v3344_v21, %v1227_v7  ;;  %2059 = vrot.lane.b32.xlu1 %v3147_v31, %s2939_s8 }
 0x1eb   : > { %v476_v18 = vpop.permute.xlu0 %475 }
 0x1ec   : > { %v490_v51 = vsel %vm485_vm2, %v460_v24, %v476_v18  ;;  %v498_v40 = vsel %vm485_vm2, %v476_v18, %v460_v24  ;;  %v478_v41 = vpop.permute.xlu1 %477  ;;  %v1272_v0 = vpack.c.bf16 %v1262_v14, %v1260_v58  ;;  %v1271_v23 = vpack.c.bf16 %v1261_v9, %v1259_v57  ;;  %v2566_v58 = vld [vmem:[%s4348_s6 + $0xc] sm:$0x3] }
 0x1ed   : > { %v522_v55 = vmul.f32 %v3300_v62, %v498_v40  ;;  %v523_v50 = vmul.f32 %v3303_v63, %v490_v51  ;;  %v491_v7 = vsel %vm485_vm2, %v462_v25, %v478_v41  ;;  %v499_v61 = vsel %vm485_vm2, %v478_v41, %v462_v25  ;;  %993 = vrot.lane.b32.xlu0 %v3165_v32, %s2938_s29 }
 0x1ee   : > { %v524_v19 = vmul.f32 %v3300_v62, %v499_v61  ;;  %v525_v24 = vmul.f32 %v3303_v63, %v491_v7  ;;  %1320 = vmatprep.subr.bf16.mxu1 %v1272_v0  ;;  %2075 = vrot.lane.b32.xlu1 %v3167_v33, %s2939_s8  ;;  %v3510_v0 = vrot.slane %v2566_v58, %v3293_v59 }
 0x1ef   : > { %v3497_v57 = vpop.permute.xlu0 %1429  ;;  %1321 = vmatpush1.bf16.msra.mxu1 %v1271_v23  ;;  %v3513_v18 = vrot.slane %v2566_v58, %v3295_v60  ;;  %v1446_v58 = vsel %vm1437_vm5, %v3311_v3, %v3252_v45 }
 0x1f0   : > { %v534_v9 = vpack.c.bf16 %v524_v19, %v522_v55  ;;  %v3502_v25 = vpop.permute.xlu1 %1431  ;;  %v535_v14 = vpack.c.bf16 %v525_v24, %v523_v50 }
 0x1f1   : > { %2057 = vrot.lane.b32.xlu0 %v3141_v30, %s2939_s8 }
 0x1f2   : > { %583 = vmatprep.subr.bf16.mxu0 %v535_v14  ;;  %787 = vrot.lane.b32.xlu1 %v3255_v46, %s2936_s18  ;;  %s2600_s18 = sshll.u32 %s3002_s28, 8  ;;  %s2411_s28 = scalar_lea.sflag [#allocation4], %s284_s13 }
 0x1f3   : > { %v1646_v51 = vpop.permute.xlu0 %1645  ;;  %584 = vmatpush1.bf16.msra.mxu0 %v534_v9  ;;  %s4300_s23 = scalar_lea.hbm %s4349_s7, %s2600_s18 }
 0x1f4   : > { %v1658_v50 = vsel %vm1653_vm4, %v1630_v42, %v1646_v51  ;;  %v1666_v19 = vsel %vm1653_vm4, %v1646_v51, %v1630_v42  ;;  %v1648_v40 = vpop.permute.xlu1 %1647 }
 0x1f5   : > { %v3520_v41 = vmul.f32 %v3510_v0, %v1658_v50  ;;  %v3523_v23 = vmul.f32 %v3513_v18, %v1666_v19  ;;  %v1659_v55 = vsel %vm1653_vm4, %v1632_v43, %v1648_v40  ;;  %v1667_v7 = vsel %vm1653_vm4, %v1648_v40, %v1632_v43  ;;  %2073 = vrot.lane.b32.xlu0 %v3165_v32, %s2939_s8  ;;  %v2557_v19 = vld [vmem:[%s4348_s6 + $0xa] sm:$0x3] }
 0x1f6   : > { %v3532_v61 = vmul.f32 %v3510_v0, %v1659_v55  ;;  %v3535_v42 = vmul.f32 %v3513_v18, %v1667_v7  ;;  %1867 = vrot.lane.b32.xlu1 %v3255_v46, %s2937_s19  ;;  %v3568_v55 = vrot.slane %v2557_v19, %v3295_v60  ;;  %s286_s19 = scalar_lea.vmem [#allocation5], %s2502_s15 }
 0x1f7   : > { %4387 = vst [vmem:[#allocation16_spill] sm:$0xff] %v3520_v41  ;;  %4388 = vst [vmem:[#allocation17_spill] sm:$0xff] %v3523_v23  ;;  %v1202_v24 = vpop.permute.xlu0 %1201  ;;  %v3581_v41 = vld [vmem:[%s4348_s6 + $0xe] sm:$0x3]  ;;  %s2425_s20 = sshll.u32 %s286_s19, 4  ;;  %s4302_s20 = int_to_ptr.vmem [resolvable:$true] %s2425_s20 }
 0x1f8   : > { %4389 = vst [vmem:[#allocation18_spill] sm:$0xff] %v3532_v61  ;;  %4390 = vst [vmem:[#allocation19_spill] sm:$0xff] %v3535_v42  ;;  %v1204_v9 = vpop.permute.xlu1 %1203  ;;  %v1447_v61 = vsel %vm1437_vm5, %v3327_v15, %v3257_v47  ;;  %v1468_v23 = vmul.f32 %v3568_v55, %v1446_v58 }
 0x1f9   : > { %981 = vrot.lane.b32.xlu0 %v3181_v34, %s2938_s29  ;;  %4393 = vst [vmem:[#allocation22_spill] sm:$0xff] %v3581_v41 }
 0x1fa   : > { %983 = vrot.lane.b32.xlu1 %v3187_v35, %s2938_s29 }
 0x1fb   : > { %v3547_v14 = vpop.permute.xlu0 %463 }
 0x1fc   : > { %v3549_v51 = vpop.permute.xlu1 %465 }
 0x1fd   : > { %997 = vrot.lane.b32.xlu0 %v3205_v36, %s2938_s29 }
 0x1fe   : > { %999 = vrot.lane.b32.xlu1 %v3207_v37, %s2938_s29 }
 0x1ff   : > { %v3555_v50 = vpop.permute.xlu0 %1417 }
 0x200   : > { %v3560_v40 = vpop.permute.xlu1 %1419 }
 0x201   : > { %2061 = vrot.lane.b32.xlu0 %v3181_v34, %s2939_s8  ;;  %v1470_v34 = vmul.f32 %v3568_v55, %v1447_v61 }
 0x202   : > { %2063 = vrot.lane.b32.xlu1 %v3187_v35, %s2939_s8  ;;  %v3602_v35 = vrot.slane %v3581_v41, %v3293_v59 }
 0x203   : > { %v3570_v7 = vpop.permute.xlu0 %1633 }
 0x204   : > { %4391 = vst [vmem:[#allocation20_spill] sm:$0xff] %v3570_v7  ;;  %v3576_v43 = vpop.permute.xlu1 %1635  ;;  %v3590_v7 = vrot.slane %v2557_v19, %v3293_v59  ;;  %v1439_v19 = vsel %vm1437_vm5, %v3257_v47, %v3327_v15  ;;  %v1448_v47 = vsel %vm1437_vm5, %v3429_v8, %v3381_v2  ;;  %v1449_v15 = vsel %vm1437_vm5, %v3431_v10, %v3383_v4 }
 0x205   : > { %4392 = vst [vmem:[#allocation21_spill] sm:$0xff] %v3576_v43  ;;  %2077 = vrot.lane.b32.xlu0 %v3205_v36, %s2939_s8  ;;  %v1438_v43 = vsel %vm1437_vm5, %v3252_v45, %v3311_v3 }
 0x206   : > { %2079 = vrot.lane.b32.xlu1 %v3207_v37, %s2939_s8 }
 0x207   : > { %v1218_v42 = vpop.permute.xlu0 %1217 }
 0x208   : > { %v1228_v60 = vsel %vm1221_vm3, %v1202_v24, %v1218_v42  ;;  %v1236_v45 = vsel %vm1221_vm3, %v1218_v42, %v1202_v24  ;;  %v1220_v3 = vpop.permute.xlu1 %1219  ;;  %v1467_v42 = vmul.f32 %v3590_v7, %v1438_v43  ;;  %v1469_v24 = vmul.f32 %v3590_v7, %v1439_v19 }
 0x209   : > { %v1263_v58 = vmul.f32 %v3347_v22, %v1236_v45  ;;  %v1264_v52 = vmul.f32 %v3344_v21, %v1228_v60  ;;  %v1229_v41 = vsel %vm1221_vm3, %v1204_v9, %v1220_v3  ;;  %v1237_v59 = vsel %vm1221_vm3, %v1220_v3, %v1204_v9  ;;  %985 = vrot.lane.b32.xlu0 %v3221_v38, %s2938_s29 }
 0x20a   : > { %v1265_v60 = vmul.f32 %v3347_v22, %v1237_v59  ;;  %v1266_v61 = vmul.f32 %v3344_v21, %v1229_v41  ;;  %987 = vrot.lane.b32.xlu1 %v3227_v39, %s2938_s29  ;;  %v1484_v22 = vpack.c.bf16 %v1470_v34, %v1468_v23  ;;  %v1472_v21 = vmul.f32 %v3568_v55, %v1448_v47 }
 0x20b   : > { %v3635_v9 = vpop.permute.xlu0 %1853  ;;  %v1474_v41 = vmul.f32 %v3568_v55, %v1449_v15  ;;  %v1440_v34 = vsel %vm1437_vm5, %v3381_v2, %v3429_v8  ;;  %v1450_v47 = vsel %vm1437_vm5, %v3497_v57, %v3453_v26  ;;  %v1451_v2 = vsel %vm1437_vm5, %v3502_v25, %v3455_v29 }
 0x20c   : > { %v1870_v45 = vsel %vm1869_vm6, %v3279_v53, %v3635_v9  ;;  %v3641_v3 = vpop.permute.xlu1 %1855  ;;  %v1274_v28 = vpack.c.bf16 %v1266_v61, %v1264_v52  ;;  %v1273_v59 = vpack.c.bf16 %v1265_v60, %v1263_v58  ;;  %v1441_v52 = vsel %vm1437_vm5, %v3383_v4, %v3431_v10  ;;  %v2796_v58 = vld [vmem:[#allocation2 + $0x60] sm:$0xff]  }
 0x20d   : > { %v3646_v43 = vmul.f32 %v3602_v35, %v1870_v45  ;;  %v1871_v19 = vsel %vm1869_vm6, %v3281_v54, %v3641_v3  ;;  %1001 = vrot.lane.b32.xlu0 %v3250_v44, %s2938_s29  ;;  %v1483_v4 = vpack.c.bf16 %v1469_v24, %v1467_v42  ;;  %v1471_v15 = vmul.f32 %v3590_v7, %v1440_v34 }
 0x20e   : > { %v3663_v23 = vmul.f32 %v3602_v35, %v1871_v19  ;;  %2067 = vrot.lane.b32.xlu1 %v3227_v39, %s2939_s8  ;;  %1322 = vmatprep.subr.bf16.mxu1 %v1274_v28  ;;  %v1473_v60 = vmul.f32 %v3590_v7, %v1441_v52  ;;  %v1442_v61 = vsel %vm1437_vm5, %v3453_v26, %v3497_v57  ;;  %v4394_v26 = vmov 0  }
 0x20f   : > { %v480_v8 = vpop.permute.xlu0 %479  ;;  %1323 = vmatpush1.bf16.msra.mxu1 %v1273_v59  ;;  %v1486_v45 = vpack.c.bf16 %v1474_v41, %v1472_v21  ;;  %v1476_v42 = vmul.f32 %v3568_v55, %v1450_v47  ;;  %v1443_v24 = vsel %vm1437_vm5, %v3455_v29, %v3502_v25  ;;  %v1478_v59 = vmul.f32 %v3568_v55, %v1451_v2  ;;  %v2797_v25 = vld [vmem:[#allocation2 + $0x68] sm:$0xff]  }
 0x210   : > { %v1915_v10 = vpack.c.bf16 %v3663_v23, %v3646_v43  ;;  %1532 = vmatprep.subr.bf16.mxu1 %v1484_v22  ;;  %v3677_v28 = vpop.permute.xlu1 %763  ;;  %v1485_v21 = vpack.c.bf16 %v1473_v60, %v1471_v15  ;;  %v1475_v41 = vmul.f32 %v3590_v7, %v1442_v61  ;;  %v1477_v19 = vmul.f32 %v3590_v7, %v1443_v24  ;;  %v2811_v23 = vld [vmem:[#allocation2 + $0xc8] sm:$0xff]  }
 0x211   : > { %2065 = vrot.lane.b32.xlu0 %v3221_v38, %s2939_s8  ;;  %v1488_v29 = vpack.c.bf16 %v1478_v59, %v1476_v42  ;;  %v500_v61 = vsel %vm485_vm2, %v480_v8, %v3547_v14  ;;  %v1663_v59 = vsel %vm1653_vm4, %v3339_v20, %v3265_v49 }
 0x212   : > { %1003 = vrot.lane.b32.xlu1 %v3255_v46, %s2938_s29  ;;  %2553 = vmatmul.mubr.msk.bf16.vlgmr.msra.gmra.mrb[0].mxu1 %vm566_vm7, %v2796_v58  ;;  %v1487_v58 = vpack.c.bf16 %v1477_v19, %v1475_v41  ;;  %s2860_s29 = scalar_lea.vmem %s4302_s20, 256 }
 0x213   : > { %v1434_v22 = vpop.permute.xlu0 %1433  ;;  %1533 = vmatpush1.bf16.msra.mxu1 %v1483_v4  ;;  %1358 = vmatprep.mubr.bf16.mxu1 %v4394_v26  ;;  %v2798_v4 = vld [vmem:[#allocation2 + $0x70] sm:$0xff]   ;;  %p2861_p6 = scmp.ne.s32.totalorder %s4302_s20, %s2860_s29 }
 0x214   : > { %1534 = vmatprep.subr.bf16.mxu1 %v1486_v45  ;;  %v3697_v57 = vpop.permute.xlu1 %779  ;;  %v492_v45 = vsel %vm485_vm2, %v3547_v14, %v480_v8  ;;  %v1444_v19 = vsel %vm1437_vm5, %v3555_v50, %v1434_v22 }
 0x215   : > { %2081 = vrot.lane.b32.xlu0 %v3250_v44, %s2939_s8  ;;  %v527_v8 = vmul.f32 %v3303_v63, %v492_v45  ;;  %v434_v45 = vpack.c.bf16 %v3097_v16, %v3089_v11  ;;  %p2862_p10 = pnand %p2861_p6, %p4412_p9 }
 0x216   : > { %2083 = vrot.lane.b32.xlu1 %v3255_v46, %s2939_s8  ;;  %s2940_s8 = smov [#allocation5]  }
 0x217   : > { %v3705_v34 = vpop.permute.xlu0 %1649  ;;  %1535 = vmatpush1.bf16.msra.mxu1 %v1485_v21  ;;  %v526_v21 = vmul.f32 %v3300_v62, %v500_v61  ;;  %p2863_p12 = pneg %p2862_p10  ;;  %s2864_s9 = sshll.u32 %s2940_s8, 4  ;;  %s2865_s9 = int_to_ptr.vmem [resolvable:$false] %s2864_s9 }
 0x218   : > { %1536 = vmatprep.subr.bf16.mxu1 %v1488_v29  ;;  %v3707_v52 = vpop.permute.xlu1 %1843  ;;  %s2866_s14 = scalar_lea.vmem %s2865_s9, 512  ;;  %p2867_p2 = scmp.lt.s32.totalorder %s4302_s20, %s2865_s9 }
 0x219   : > { %p2868_p3 = scmp.lt.s32.totalorder %s2866_s14, %s2860_s29 }
 0x21a   : > { %2554 = vmatmul.mubr.msk.bf16.gmra.mrb[4].mxu1 %vm566_vm7, %v2797_v25 }
 0x21b   : > { %v3710_v47 = vpop.permute.xlu0 %761  ;;  %1537 = vmatpush1.bf16.msra.mxu1 %v1487_v58  ;;  %1368 = vmatprep.mubr.bf16.mxu1 %v4394_v26  ;;  %v2799_v58 = vld [vmem:[#allocation2 + $0x78] sm:$0xff]   ;;  %p2869_p4 = por %p2868_p3, %p2867_p2 }
 0x21c   : > { %v3713_v2 = vpop.permute.xlu1 %1859 }
 0x21d   : > { %p2870_p7 = pnand %p2869_p4, %p2863_p12 }
 0x21f   : > { %v3715_v15 = vpop.permute.xlu0 %777 }
 0x220   : > { %v3717_v60 = vpop.permute.xlu1 %767 }
 0x222   : > { %2555 = vmatmul.mubr.msk.bf16.gmra.mrb[8].mxu1 %vm566_vm7, %v2798_v4  ;;  %v1452_v4 = vsel %vm1437_vm5, %v1434_v22, %v3555_v50 }
 0x223   : > { %v3726_v42 = vpop.permute.xlu0 %1841  ;;  %1378 = vmatprep.mubr.bf16.mxu1 %v4394_v26 }
 0x224   : > { %v482_v24 = vpop.permute.xlu1 %481 }
 0x225   : > { %v493_v41 = vsel %vm485_vm2, %v3549_v51, %v482_v24  ;;  %v501_v14 = vsel %vm485_vm2, %v482_v24, %v3549_v51  ;;  %v435_v51 = vpack.c.bf16 %v3121_v27, %v3091_v13  ;;  %v1479_v13 = vmul.f32 %v3590_v7, %v1444_v19 }
 0x226   : > { %v528_v29 = vmul.f32 %v3300_v62, %v501_v14  ;;  %v529_v25 = vmul.f32 %v3303_v63, %v493_v41  ;;  %v1662_v62 = vsel %vm1653_vm4, %v3325_v12, %v3263_v48  ;;  %v1655_v63 = vsel %vm1653_vm4, %v3265_v49, %v3339_v20  ;;  %v2800_v20 = vld [vmem:[#allocation2] sm:$0xff]  }
 0x227   : > { %v3749_v61 = vpop.permute.xlu0 %1857  ;;  %v1686_v41 = vmul.f32 %v3513_v18, %v1663_v59  ;;  %v1480_v27 = vmul.f32 %v3568_v55, %v1452_v4  ;;  %v2270_v59 = vld [vmem:[%s4345_s3 + $0x8] sm:$0xff]  ;;  %v1654_v19 = vsel %vm1653_vm4, %v3263_v48, %v3325_v12  ;;  %v1685_v4 = vmul.f32 %v3510_v0, %v1655_v63  ;;  %v2801_v63 = vld [vmem:[#allocation2 + $0xa0] sm:$0xff]  }
 0x228   : > { %v536_v24 = vpack.c.bf16 %v528_v29, %v526_v21  ;;  %v1436_v50 = vpop.permute.xlu1 %1435  ;;  %v537_v22 = vpack.c.bf16 %v529_v25, %v527_v8  ;;  %v2269_v21 = vld [vmem:[%s4345_s3] sm:$0xff]  ;;  %2284 = vperm.xlu1 %2791, %v2270_v59   ;;  %v1657_v12 = vsel %vm1653_vm4, %v3391_v6, %v3439_v17 }
 0x229   : > { %v1445_v11 = vsel %vm1437_vm5, %v3560_v40, %v1436_v50  ;;  %v1453_v16 = vsel %vm1437_vm5, %v1436_v50, %v3560_v40  ;;  %v1684_v40 = vmul.f32 %v3513_v18, %v1662_v62  ;;  %v1656_v62 = vsel %vm1653_vm4, %v3389_v5, %v3437_v1  ;;  %2279 = vperm.xlu0 %2790, %v2269_v21  }
 0x22a   : > { %v1481_v14 = vmul.f32 %v3590_v7, %v1445_v11  ;;  %v1482_v49 = vmul.f32 %v3568_v55, %v1453_v16  ;;  %585 = vmatprep.subr.bf16.mxu0 %v537_v22  ;;  %2556 = vmatmul.mubr.msk.bf16.gmra.mrb[12].mxu1 %vm566_vm7, %v2799_v58  ;;  %v1664_v7 = vsel %vm1653_vm4, %v3437_v1, %v3389_v5  ;;  %v2271_v5 = vld [vmem:[%s4345_s3 + $0x10] sm:$0xff]  ;;  %v3829_v22 = vld [vmem:[%s4348_s6 + $0x2] sm:$0x3]  ;;  %v2802_v11 = vld [vmem:[#allocation2 + $0x8] sm:$0xff]  }
 0x22b   : > { %v1665_v55 = vsel %vm1653_vm4, %v3439_v17, %v3391_v6  ;;  %v3790_v8 = vpop.permute.xlu0 %765  ;;  %586 = vmatpush1.bf16.msra.mxu0 %v536_v24  ;;  %1564 = vmatprep.mubr.bf16.mxu1 %v4394_v26  ;;  %v437_v24 = vpack.c.bf16 %v3167_v33, %v3165_v32  ;;  %v1700_v50 = vpack.c.bf16 %v1686_v41, %v1684_v40  ;;  %v2272_v6 = vld [vmem:[%s4345_s3 + $0x18] sm:$0xff]  ;;  %v2273_v16 = vld [vmem:[%s4345_s3 + $0x20] sm:$0xff]  ;;  %v4398_v40 = vld [vmem:[#allocation14_spill] sm:$0xff] }
 0x22c   : > { %v1489_v29 = vpack.c.bf16 %v1481_v14, %v1479_v13  ;;  %684 = vmatprep.subr.bf16.mxu0 %v435_v51  ;;  %v3797_v25 = vpop.permute.xlu1 %783  ;;  %v1490_v58 = vpack.c.bf16 %v1482_v49, %v1480_v27  ;;  %v1688_v48 = vmul.f32 %v3513_v18, %v1664_v7  ;;  %v1690_v51 = vmul.f32 %v3513_v18, %v1665_v55  ;;  %v4395_v27 = vld [vmem:[#allocation15_spill] sm:$0xff]  ;;  %v4399_v7 = vld [vmem:[#allocation10_spill] sm:$0xff] }
 0x22d   : > { %v1683_v32 = vmul.f32 %v3510_v0, %v1654_v19  ;;  %v436_v17 = vpack.c.bf16 %v3147_v31, %v3141_v30  ;;  %v1689_v13 = vmul.f32 %v3510_v0, %v1657_v12  ;;  %2289 = vperm.xlu1 %2791, %v2271_v5   ;;  %v439_v30 = vpack.c.bf16 %v3207_v37, %v3205_v36  ;;  %v4396_v14 = vld [vmem:[#allocation11_spill] sm:$0xff]  ;;  %v2274_v36 = vld [vmem:[%s4345_s3 + $0x28] sm:$0xff] }
 0x22e   : > { %2518 = vmatmul.mubr.msk.bf16.vlgmr.msra.gmra.mrb[16].mxu0 %vm566_vm7, %v2800_v20  ;;  %1538 = vmatprep.subr.bf16.mxu1 %v1490_v58  ;;  %v1702_v31 = vpack.c.bf16 %v1690_v51, %v1688_v48  ;;  %v791_v49 = vsel %vm789_vm8, %v4396_v14, %v4395_v27  ;;  %v4397_v37 = vld [vmem:[#allocation13_spill] sm:$0xff]  ;;  %v790_v55 = vsel %vm789_vm8, %v4399_v7, %v4398_v40  ;;  %v2275_v48 = vld [vmem:[%s4345_s3 + $0x30] sm:$0xff]  ;;  %v2276_v51 = vld [vmem:[%s4345_s3 + $0x38] sm:$0xff] }
 0x22f   : > { %v3817_v33 = vpop.permute.xlu0 %781  ;;  %685 = vmatpush1.bf16.msra.mxu0 %v434_v45  ;;  %1539 = vmatpush1.bf16.msra.mxu1 %v1489_v29  ;;  %v1699_v41 = vpack.c.bf16 %v1685_v4, %v1683_v32  ;;  %v1687_v45 = vmul.f32 %v3510_v0, %v1656_v62  ;;  %v3852_v59 = vrot.slane %v3829_v22, %v4397_v37  ;;  %v4400_v29 = vld [vmem:[#allocation8_spill] sm:$0xff]  ;;  %v4401_v58 = vld [vmem:[#allocation9_spill] sm:$0xff]  ;;  %v4402_v5 = vld [vmem:[#allocation19_spill] sm:$0xff] }
 0x230   : > { %686 = vmatprep.subr.bf16.mxu0 %v437_v24  ;;  %1748 = vmatprep.subr.bf16.mxu1 %v1700_v50  ;;  %v3822_v1 = vpop.permute.xlu1 %1847  ;;  %v438_v4 = vpack.c.bf16 %v4401_v58, %v4400_v29  ;;  %v441_v24 = vpack.c.bf16 %v3255_v46, %v3250_v44  ;;  %v2803_v50 = vld [vmem:[#allocation2 + $0xa8] sm:$0xff]   ;;  %v440_v46 = vpack.c.bf16 %v3227_v39, %v3221_v38  ;;  %v2805_v39 = vld [vmem:[#allocation2 + $0xb0] sm:$0xff]   ;;  %v2806_v29 = vld [vmem:[#allocation2 + $0x18] sm:$0xff]  }
 0x231   : > { %621 = vmatprep.mubr.bf16.mxu0 %v4394_v26  ;;  %2294 = vperm.xlu0 %2790, %v2272_v6   ;;  %v1701_v19 = vpack.c.bf16 %v1689_v13, %v1687_v45  ;;  %v822_v62 = vmul.f32 %v3852_v59, %v791_v49  ;;  %v4403_v32 = vld [vmem:[#allocation17_spill] sm:$0xff]  ;;  %v2358_v45 = vld [vmem:[%s4347_s5] sm:$0xff]  ;;  %v798_v58 = vsel %vm789_vm8, %v4398_v40, %v4399_v7 }
 0x232   : > { %2562 = vmatmul.mubr.msk.bf16.vlgmr.msra.gmra.mrb[0].mxu1 %vm566_vm7, %v2801_v63  ;;  %2299 = vperm.xlu1 %2791, %v2273_v16   ;;  %v820_v63 = vmul.f32 %v3852_v59, %v790_v55  ;;  %v4404_v6 = vpack.c.bf16 %v4402_v5, %v4403_v32  ;;  %v4408_v55 = vld [vmem:[#allocation12_spill] sm:$0xff]  ;;  %v793_v32 = vsel %vm789_vm8, %v3677_v28, %v3697_v57 }
 0x233   : > { %v3845_v20 = vpop.permute.xlu0 %1845  ;;  %687 = vmatpush1.bf16.msra.mxu0 %v436_v17  ;;  %1749 = vmatpush1.bf16.msra.mxu1 %v1699_v41  ;;  %v2804_v41 = vld [vmem:[#allocation2 + $0x10] sm:$0xff]  }
 0x234   : > { %688 = vmatprep.subr.bf16.mxu0 %v439_v30  ;;  %1750 = vmatprep.subr.bf16.mxu1 %v1702_v31  ;;  %v3854_v21 = vpop.permute.xlu1 %1863  ;;  %v836_v17 = vpack.c.bf16 %v822_v62, %v820_v63  ;;  %v4405_v30 = vld [vmem:[#allocation18_spill] sm:$0xff]  ;;  %v4406_v31 = vld [vmem:[#allocation16_spill] sm:$0xff] }
 0x235   : > { %1574 = vmatprep.mubr.bf16.mxu1 %v4394_v26  ;;  %2304 = vperm.xlu0 %2790, %v2274_v36   ;;  %v799_v36 = vsel %vm789_vm8, %v4395_v27, %v4396_v14  ;;  %v1879_v14 = vsel %vm1869_vm6, %v3641_v3, %v3281_v54 }
 0x236   : > { %2519 = vmatmul.mubr.msk.bf16.gmra.mrb[20].mxu0 %vm566_vm7, %v2802_v11  ;;  %2309 = vperm.xlu1 %2791, %v2275_v48   ;;  %v4407_v11 = vpack.c.bf16 %v4405_v30, %v4406_v31  ;;  %v800_v31 = vsel %vm789_vm8, %v3715_v15, %v3710_v47 }
 0x237   : > { %v3870_v12 = vpop.permute.xlu0 %1861  ;;  %689 = vmatpush1.bf16.msra.mxu0 %v438_v4  ;;  %1751 = vmatpush1.bf16.msra.mxu1 %v1701_v19  ;;  %v3908_v19 = vrot.slane %v3829_v22, %v4408_v55  ;;  %v4409_v4 = vld [vmem:[#allocation22_spill] sm:$0xff]  ;;  %v1878_v22 = vsel %vm1869_vm6, %v3635_v9, %v3279_v53  ;;  %v2807_v53 = vld [vmem:[#allocation2 + $0xb8] sm:$0xff]  }
 0x238   : > { %1752 = vmatprep.subr.bf16.mxu1 %v4404_v6  ;;  %v3879_v44 = vpop.permute.xlu1 %771  ;;  %690 = vmatprep.subr.bf16.mxu0 %v441_v24  ;;  %v3917_v62 = vrot.slane %v4409_v4, %v4397_v37  ;;  %v794_v4 = vsel %vm789_vm8, %v3790_v8, %v3817_v33 }
 0x239   : > { %631 = vmatprep.mubr.bf16.mxu0 %v4394_v26  ;;  %2314 = vperm.xlu0 %2790, %v2276_v51   ;;  %v821_v27 = vmul.f32 %v3908_v19, %v799_v36  ;;  %v819_v7 = vmul.f32 %v3908_v19, %v798_v58  ;;  %v792_v51 = vsel %vm789_vm8, %v3710_v47, %v3715_v15  ;;  %v2808_v36 = vld [vmem:[#allocation2 + $0x80] sm:$0xff]  }
 0x23a   : > { %2563 = vmatmul.mubr.msk.bf16.gmra.mrb[4].mxu1 %vm566_vm7, %v2803_v50  ;;  %2361 = vperm.xlu1 %2791, %v2358_v45   ;;  %v4410_v50 = vld [vmem:[#allocation20_spill] sm:$0xff]  ;;  %v1900_v9 = vmul.f32 %v3917_v62, %v1878_v22  ;;  %v1902_v54 = vmul.f32 %v3917_v62, %v1879_v14  ;;  %v1880_v58 = vsel %vm1869_vm6, %v3749_v61, %v3726_v42 }
 0x23b   : > { %v3888_v13 = vpop.permute.xlu0 %769  ;;  %691 = vmatpush1.bf16.msra.mxu0 %v440_v46  ;;  %1753 = vmatpush1.bf16.msra.mxu1 %v4407_v11  ;;  %v1660_v48 = vsel %vm1653_vm4, %v4410_v50, %v3705_v34  ;;  %v1668_v3 = vsel %vm1653_vm4, %v3705_v34, %v4410_v50  ;;  %v835_v5 = vpack.c.bf16 %v821_v27, %v819_v7 }
 0x23c   : > { %v3893_v38 = vpop.permute.xlu1 %1851  ;;  %884 = vmatprep.subr.bf16.mxu0 %v836_v17  ;;  %1584 = vmatprep.mubr.bf16.mxu1 %v4394_v26  ;;  %v1695_v46 = vmul.f32 %v3510_v0, %v1660_v48  ;;  %v824_v17 = vmul.f32 %v3852_v59, %v792_v51  ;;  %v1696_v30 = vmul.f32 %v3513_v18, %v1668_v3 }
 0x23d   : > { %v1881_v15 = vsel %vm1869_vm6, %v3713_v2, %v3707_v52  ;;  %v823_v7 = vmul.f32 %v3908_v19, %v800_v31  ;;  %v1872_v50 = vsel %vm1869_vm6, %v3726_v42, %v3749_v61  ;;  %v1904_v48 = vmul.f32 %v3917_v62, %v1880_v58 }
 0x23e   : > { %2520 = vmatmul.mubr.msk.bf16.gmra.mrb[24].mxu0 %vm566_vm7, %v2804_v41  ;;  %v4411_v41 = vld [vmem:[#allocation21_spill] sm:$0xff]  ;;  %v802_v51 = vsel %vm789_vm8, %v3817_v33, %v3790_v8  ;;  %v1873_v61 = vsel %vm1869_vm6, %v3707_v52, %v3713_v2  ;;  %v1906_v33 = vmul.f32 %v3917_v62, %v1881_v15  ;;  %v803_v3 = vsel %vm789_vm8, %v3797_v25, %v3717_v60 }
 0x23f   : > { %v3897_v16 = vpop.permute.xlu0 %785  ;;  %641 = vmatprep.mubr.bf16.mxu0 %v4394_v26 }
 0x240   : > { %v3900_v49 = vpop.permute.xlu1 %975 }
 0x242   : > { %2564 = vmatmul.mubr.msk.bf16.gmra.mrb[8].mxu1 %vm566_vm7, %v2805_v39 }
 0x243   : > { %v3919_v24 = vpop.permute.xlu0 %1849  ;;  %1594 = vmatprep.mubr.bf16.mxu1 %v4394_v26 }
 0x244   : > { %v3931_v40 = vpop.permute.xlu1 %991 }
 0x246   : > { %2521 = vmatmul.mubr.msk.bf16.gmra.mrb[28].mxu0 %vm566_vm7, %v2806_v29  ;;  %v826_v29 = vmul.f32 %v3852_v59, %v793_v32 }
 0x247   : > { %v3949_v63 = vpop.permute.xlu0 %1865  ;;  %716 = vmatprep.mubr.bf16.mxu0 %v4394_v26 }
 0x248   : > { %v1652_v6 = vpop.permute.xlu1 %1651 }
 0x249   : > { %v1661_v45 = vsel %vm1653_vm4, %v4411_v41, %v1652_v6  ;;  %v1669_v34 = vsel %vm1653_vm4, %v1652_v6, %v4411_v41  ;;  %v1903_v6 = vmul.f32 %v3602_v35, %v1872_v50  ;;  %v1918_v41 = vpack.c.bf16 %v1906_v33, %v1904_v48  ;;  %v2584_v50 = vld [vmem:[%s4348_s6 + $0x10] sm:$0x3] }
 0x24a   : > { %v1697_v11 = vmul.f32 %v3510_v0, %v1661_v45  ;;  %v1698_v39 = vmul.f32 %v3513_v18, %v1669_v34  ;;  %2565 = vmatmul.mubr.msk.bf16.gmra.mrb[12].mxu1 %vm566_vm7, %v2807_v53  ;;  %v1916_v0 = vpack.c.bf16 %v1902_v54, %v1900_v9  ;;  %v801_v18 = vsel %vm789_vm8, %v3697_v57, %v3677_v28  ;;  %v2809_v9 = vld [vmem:[#allocation2 + $0xc0] sm:$0xff]   ;;  %v2810_v45 = vld [vmem:[#allocation2 + $0x88] sm:$0xff]  }
 0x24b   : > { %v3981_v47 = vpop.permute.xlu0 %973  ;;  %1780 = vmatprep.mubr.bf16.mxu1 %v4394_v26  ;;  %v795_v28 = vsel %vm789_vm8, %v3717_v60, %v3797_v25  ;;  %v838_v57 = vpack.c.bf16 %v826_v29, %v824_v17  ;;  %v828_v53 = vmul.f32 %v3852_v59, %v794_v4  ;;  %v825_v42 = vmul.f32 %v3908_v19, %v801_v18  ;;  %v2812_v4 = vld [vmem:[#allocation2 + $0x90] sm:$0xff]   ;;  %v2539_v18 = vld [vmem:[%s4348_s6 + $0x4] sm:$0x3] }
 0x24c   : > { %v1705_v27 = vpack.c.bf16 %v1697_v11, %v1695_v46  ;;  %v3992_v22 = vpop.permute.xlu1 %2055  ;;  %v1706_v14 = vpack.c.bf16 %v1698_v39, %v1696_v30  ;;  %v1882_v54 = vsel %vm1869_vm6, %v3870_v12, %v3845_v20  ;;  %v830_v32 = vmul.f32 %v3852_v59, %v795_v28 }
 0x24d   : > { %v837_v2 = vpack.c.bf16 %v825_v42, %v823_v7  ;;  %v1883_v46 = vsel %vm1869_vm6, %v3854_v21, %v3822_v1  ;;  %v1874_v60 = vsel %vm1869_vm6, %v3845_v20, %v3870_v12  ;;  %v1908_v25 = vmul.f32 %v3917_v62, %v1882_v54 }
 0x24e   : > { %2526 = vmatmul.mubr.msk.bf16.vlgmr.msra.gmra.mrb[16].mxu0 %vm566_vm7, %v2808_v36  ;;  %1754 = vmatprep.subr.bf16.mxu1 %v1706_v14  ;;  %v840_v17 = vpack.c.bf16 %v830_v32, %v828_v53  ;;  %v1905_v34 = vmul.f32 %v3602_v35, %v1873_v61  ;;  %v829_v30 = vmul.f32 %v3908_v19, %v803_v3 }
 0x24f   : > { %885 = vmatpush1.bf16.msra.mxu0 %v835_v5  ;;  %v4019_v8 = vpop.permute.xlu0 %989  ;;  %1755 = vmatpush1.bf16.msra.mxu1 %v1705_v27  ;;  %v827_v5 = vmul.f32 %v3908_v19, %v802_v51  ;;  %v1875_v20 = vsel %vm1869_vm6, %v3822_v1, %v3854_v21  ;;  %v1910_v12 = vmul.f32 %v3917_v62, %v1883_v46  ;;  %v2813_v27 = vld [vmem:[#allocation2 + $0xd0] sm:$0xff]  }
 0x250   : > { %886 = vmatprep.subr.bf16.mxu0 %v838_v57  ;;  %1964 = vmatprep.subr.bf16.mxu1 %v1916_v0  ;;  %v4027_v52 = vpop.permute.xlu1 %2071  ;;  %v1917_v39 = vpack.c.bf16 %v1905_v34, %v1903_v6  ;;  %v1907_v29 = vmul.f32 %v3602_v35, %v1874_v60  ;;  %v804_v14 = vsel %vm789_vm8, %v3897_v16, %v3888_v13  ;;  %v2815_v34 = vld [vmem:[#allocation2 + $0xd8] sm:$0xff]  }
 0x251   : > { %726 = vmatprep.mubr.bf16.mxu0 %v4394_v26  ;;  %v839_v36 = vpack.c.bf16 %v829_v30, %v827_v5  ;;  %v1920_v43 = vpack.c.bf16 %v1910_v12, %v1908_v25  ;;  %v4077_v7 = vrot.slane %v2539_v18, %v4408_v55  ;;  %v796_v57 = vsel %vm789_vm8, %v3888_v13, %v3897_v16 }
 0x252   : > { %2571 = vmatmul.mubr.msk.bf16.vlgmr.msra.gmra.mrb[0].mxu1 %vm566_vm7, %v2809_v9  ;;  %v4088_v48 = vrot.slane %v2539_v18, %v4397_v37  ;;  %v1015_v51 = vsel %vm1005_vm9, %v3931_v40, %v3900_v49  ;;  %v1006_v53 = vsel %vm1005_vm9, %v3981_v47, %v4019_v8  ;;  %v1007_v13 = vsel %vm1005_vm9, %v3900_v49, %v3931_v40  ;;  %v2814_v49 = vld [vmem:[#allocation2 + $0x98] sm:$0xff]  }
 0x253   : > { %887 = vmatpush1.bf16.msra.mxu0 %v837_v2  ;;  %v4044_v31 = vpop.permute.xlu0 %2053  ;;  %1965 = vmatpush1.bf16.msra.mxu1 %v1915_v10  ;;  %v1909_v10 = vmul.f32 %v3602_v35, %v1875_v20  ;;  %v1876_v16 = vsel %vm1869_vm6, %v3919_v24, %v3949_v63  ;;  %v831_v42 = vmul.f32 %v3908_v19, %v804_v14 }
 0x254   : > { %888 = vmatprep.subr.bf16.mxu0 %v840_v17  ;;  %1966 = vmatprep.subr.bf16.mxu1 %v1918_v41  ;;  %v4054_v11 = vpop.permute.xlu1 %979  ;;  %v1884_v61 = vsel %vm1869_vm6, %v3949_v63, %v3919_v24  ;;  %v4115_v54 = vrot.slane %v2584_v50, %v4408_v55  ;;  %v4118_v33 = vrot.slane %v2584_v50, %v4397_v37 }
 0x255   : > { %1790 = vmatprep.mubr.bf16.mxu1 %v4394_v26  ;;  %v1919_v58 = vpack.c.bf16 %v1909_v10, %v1907_v29  ;;  %v832_v40 = vmul.f32 %v3852_v59, %v796_v57  ;;  %v4123_v3 = vmul.f32 %v4077_v7, %v1015_v51  ;;  %v1014_v32 = vsel %vm1005_vm9, %v4019_v8, %v3981_v47 }
 0x256   : > { %2527 = vmatmul.mubr.msk.bf16.gmra.mrb[20].mxu0 %vm566_vm7, %v2810_v45  ;;  %v1036_v24 = vmul.f32 %v4088_v48, %v1006_v53  ;;  %v1038_v37 = vmul.f32 %v4088_v48, %v1007_v13  ;;  %v1911_v63 = vmul.f32 %v3602_v35, %v1876_v16  ;;  %v2087_v2 = vsel %vm2085_vm10, %v3992_v22, %v4027_v52 }
 0x257   : > { %889 = vmatpush1.bf16.msra.mxu0 %v839_v36  ;;  %v2070_v1 = vpop.permute.xlu0 %2069  ;;  %1967 = vmatpush1.bf16.msra.mxu1 %v1917_v39  ;;  %v1912_v47 = vmul.f32 %v3917_v62, %v1884_v61  ;;  %v1035_v25 = vmul.f32 %v4077_v7, %v1014_v32  ;;  %v2095_v17 = vsel %vm2085_vm10, %v4027_v52, %v3992_v22 }
 0x258   : > { %1968 = vmatprep.subr.bf16.mxu1 %v1920_v43  ;;  %v4060_v21 = vpop.permute.xlu1 %995  ;;  %736 = vmatprep.mubr.bf16.mxu0 %v4394_v26  ;;  %v2086_v6 = vsel %vm2085_vm10, %v4044_v31, %v2070_v1  ;;  %v2094_v8 = vsel %vm2085_vm10, %v2070_v1, %v4044_v31  ;;  %v4159_v30 = vmul.f32 %v4115_v54, %v2087_v2 }
 0x259   : > { %v4162_v31 = vmul.f32 %v4115_v54, %v2086_v6  ;;  %v1052_v12 = vpack.c.bf16 %v1038_v37, %v1036_v24  ;;  %v1009_v36 = vsel %vm1005_vm9, %v4054_v11, %v4060_v21  ;;  %v1017_v29 = vsel %vm1005_vm9, %v4060_v21, %v4054_v11 }
 0x25a   : > { %2572 = vmatmul.mubr.msk.bf16.gmra.mrb[4].mxu1 %vm566_vm7, %v2811_v23  ;;  %v2118_v11 = vmul.f32 %v4118_v33, %v2095_v17  ;;  %v1051_v50 = vpack.c.bf16 %v4123_v3, %v1035_v25  ;;  %v1041_v57 = vmul.f32 %v4077_v7, %v1017_v29 }
 0x25b   : > { %v978_v0 = vpop.permute.xlu0 %977  ;;  %1969 = vmatpush1.bf16.msra.mxu1 %v1919_v58  ;;  %1800 = vmatprep.mubr.bf16.mxu1 %v4394_v26 }
 0x25c   : > { %v4068_v15 = vpop.permute.xlu1 %2059 }
 0x25e   : > { %2528 = vmatmul.mubr.msk.bf16.gmra.mrb[24].mxu0 %vm566_vm7, %v2812_v4  ;;  %v2816_v4 = vld [vmem:[#allocation2 + $0x20] sm:$0xff]  }
 0x25f   : > { %v994_v28 = vpop.permute.xlu0 %993  ;;  %746 = vmatprep.mubr.bf16.mxu0 %v4394_v26 }
 0x260   : > { %v4098_v9 = vpop.permute.xlu1 %2075 }
 0x262   : > { %2573 = vmatmul.mubr.msk.bf16.gmra.mrb[8].mxu1 %vm566_vm7, %v2813_v27 }
 0x263   : > { %v2058_v55 = vpop.permute.xlu0 %2057  ;;  %1810 = vmatprep.mubr.bf16.mxu1 %v4394_v26 }
 0x264   : > { %v788_v5 = vpop.permute.xlu1 %787 }
 0x265   : > { %v797_v46 = vsel %vm789_vm8, %v3879_v44, %v788_v5  ;;  %v805_v60 = vsel %vm789_vm8, %v788_v5, %v3879_v44  ;;  %v1008_v44 = vsel %vm1005_vm9, %v978_v0, %v994_v28 }
 0x266   : > { %v833_v41 = vmul.f32 %v3908_v19, %v805_v60  ;;  %v834_v45 = vmul.f32 %v3852_v59, %v797_v46  ;;  %2529 = vmatmul.mubr.msk.bf16.gmra.mrb[28].mxu0 %vm566_vm7, %v2814_v49  ;;  %v2116_v19 = vmul.f32 %v4118_v33, %v2094_v8  ;;  %v1016_v59 = vsel %vm1005_vm9, %v994_v28, %v978_v0  ;;  %v2818_v8 = vld [vmem:[#allocation2 + $0x28] sm:$0xff]  }
 0x267   : > { %v2074_v20 = vpop.permute.xlu0 %2073  ;;  %916 = vmatprep.mubr.bf16.mxu0 %v4394_v26  ;;  %v1040_v10 = vmul.f32 %v4088_v48, %v1008_v44  ;;  %v1039_v21 = vmul.f32 %v4077_v7, %v1016_v59  ;;  %v2131_v28 = vpack.c.bf16 %v4159_v30, %v4162_v31  ;;  %v2089_v49 = vsel %vm2085_vm10, %v4068_v15, %v4098_v9 }
 0x268   : > { %v841_v22 = vpack.c.bf16 %v833_v41, %v831_v42  ;;  %v1868_v52 = vpop.permute.xlu1 %1867  ;;  %v842_v39 = vpack.c.bf16 %v834_v45, %v832_v40  ;;  %v2096_v0 = vsel %vm2085_vm10, %v2074_v20, %v2058_v55  ;;  %v2088_v51 = vsel %vm2085_vm10, %v2058_v55, %v2074_v20  ;;  %v2817_v42 = vld [vmem:[#allocation2 + $0xe0] sm:$0xff]  }
 0x269   : > { %v1877_v43 = vsel %vm1869_vm6, %v3893_v38, %v1868_v52  ;;  %v1885_v23 = vsel %vm1869_vm6, %v1868_v52, %v3893_v38  ;;  %v1042_v38 = vmul.f32 %v4088_v48, %v1009_v36  ;;  %v2120_v53 = vmul.f32 %v4118_v33, %v2096_v0  ;;  %v2820_v36 = vld [vmem:[#allocation2 + $0x30] sm:$0xff]  }
 0x26a   : > { %v1913_v1 = vmul.f32 %v3602_v35, %v1877_v43  ;;  %v1914_v58 = vmul.f32 %v3917_v62, %v1885_v23  ;;  %890 = vmatprep.subr.bf16.mxu0 %v842_v39  ;;  %2574 = vmatmul.mubr.msk.bf16.gmra.mrb[12].mxu1 %vm566_vm7, %v2815_v34  ;;  %v2097_v35 = vsel %vm2085_vm10, %v4098_v9, %v4068_v15  ;;  %v2819_v34 = vld [vmem:[#allocation2 + $0xe8] sm:$0xff]  }
 0x26b   : > { %v982_v18 = vpop.permute.xlu0 %981  ;;  %891 = vmatpush1.bf16.msra.mxu0 %v841_v22  ;;  %1996 = vmatprep.mubr.bf16.mxu1 %v4394_v26  ;;  %v2132_v13 = vpack.c.bf16 %v2118_v11, %v2116_v19  ;;  %v1054_v16 = vpack.c.bf16 %v1042_v38, %v1040_v10  ;;  %v1053_v61 = vpack.c.bf16 %v1041_v57, %v1039_v21  ;;  %v2822_v11 = vld [vmem:[#allocation2 + $0x38] sm:$0xff]  }
 0x26c   : > { %v1921_v62 = vpack.c.bf16 %v1913_v1, %v1911_v63  ;;  %v984_v27 = vpop.permute.xlu1 %983  ;;  %1100 = vmatprep.subr.bf16.mxu0 %v1052_v12  ;;  %v1922_v14 = vpack.c.bf16 %v1914_v58, %v1912_v47  ;;  %v2122_v40 = vmul.f32 %v4118_v33, %v2097_v35  ;;  %v2119_v32 = vmul.f32 %v4115_v54, %v2088_v51  ;;  %v2821_v1 = vld [vmem:[#allocation2 + $0xf0] sm:$0xff]   ;;  %v2823_v57 = vld [vmem:[#allocation2 + $0xf8] sm:$0xff]  }
 0x26d   : > { %v2121_v46 = vmul.f32 %v4115_v54, %v2089_v49 }
 0x26e   : > { %2535 = vmatmul.mubr.msk.bf16.vlgmr.msra.gmra.mrb[16].mxu0 %vm566_vm7, %v2816_v4  ;;  %1970 = vmatprep.subr.bf16.mxu1 %v1922_v14  ;;  %v2134_v47 = vpack.c.bf16 %v2122_v40, %v2120_v53 }
 0x26f   : > { %v998_v3 = vpop.permute.xlu0 %997  ;;  %1101 = vmatpush1.bf16.msra.mxu0 %v1051_v50  ;;  %1971 = vmatpush1.bf16.msra.mxu1 %v1921_v62  ;;  %v2133_v45 = vpack.c.bf16 %v2121_v46, %v2119_v32 }
 0x270   : > { %v1010_v24 = vsel %vm1005_vm9, %v982_v18, %v998_v3  ;;  %v1018_v55 = vsel %vm1005_vm9, %v998_v3, %v982_v18  ;;  %2180 = vmatprep.subr.bf16.mxu1 %v2132_v13  ;;  %v1000_v37 = vpop.permute.xlu1 %999  ;;  %1102 = vmatprep.subr.bf16.mxu0 %v1054_v16 }
 0x271   : > { %v1043_v63 = vmul.f32 %v4077_v7, %v1018_v55  ;;  %v1044_v15 = vmul.f32 %v4088_v48, %v1010_v24  ;;  %v1011_v9 = vsel %vm1005_vm9, %v984_v27, %v1000_v37  ;;  %v1019_v2 = vsel %vm1005_vm9, %v1000_v37, %v984_v27  ;;  %926 = vmatprep.mubr.bf16.mxu0 %v4394_v26  ;;  %v2824_v24 = vld [vmem:[#allocation2 + $0x40] sm:$0xff]  }
 0x272   : > { %v1045_v6 = vmul.f32 %v4077_v7, %v1019_v2  ;;  %v1046_v5 = vmul.f32 %v4088_v48, %v1011_v9  ;;  %2580 = vmatmul.mubr.msk.bf16.vlgmr.msra.gmra.mrb[0].mxu1 %vm566_vm7, %v2817_v42  ;;  %v2830_v9 = vld [vmem:[#allocation2 + $0x58] sm:$0xff]  }
 0x273   : > { %v2062_v60 = vpop.permute.xlu0 %2061  ;;  %1103 = vmatpush1.bf16.msra.mxu0 %v1053_v61  ;;  %2181 = vmatpush1.bf16.msra.mxu1 %v2131_v28  ;;  %v2831_v2 = vld [vmem:[#allocation2 + $0x118] sm:$0xff]  }
 0x274   : > { %v1055_v25 = vpack.c.bf16 %v1045_v6, %v1043_v63  ;;  %2182 = vmatprep.subr.bf16.mxu1 %v2134_v47  ;;  %v2064_v17 = vpop.permute.xlu1 %2063  ;;  %v1056_v41 = vpack.c.bf16 %v1046_v5, %v1044_v15  ;;  %2006 = vmatprep.mubr.bf16.mxu1 %v4394_v26  ;;  %v2825_v63 = vld [vmem:[#allocation2 + $0x100] sm:$0xff]   ;;  %v2829_v15 = vld [vmem:[#allocation2 + $0x110] sm:$0xff]  }
 0x276   : > { %2536 = vmatmul.mubr.msk.bf16.gmra.mrb[20].mxu0 %vm566_vm7, %v2818_v8  ;;  %1104 = vmatprep.subr.bf16.mxu0 %v1056_v41 }
 0x277   : > { %v2078_v30 = vpop.permute.xlu0 %2077  ;;  %1105 = vmatpush1.bf16.msra.mxu0 %v1055_v25  ;;  %2183 = vmatpush1.bf16.msra.mxu1 %v2133_v45 }
 0x278   : > { %v2090_v31 = vsel %vm2085_vm10, %v2062_v60, %v2078_v30  ;;  %v2098_v44 = vsel %vm2085_vm10, %v2078_v30, %v2062_v60  ;;  %v2080_v20 = vpop.permute.xlu1 %2079  ;;  %936 = vmatprep.mubr.bf16.mxu0 %v4394_v26 }
 0x279   : > { %v2123_v12 = vmul.f32 %v4115_v54, %v2090_v31  ;;  %v2124_v19 = vmul.f32 %v4118_v33, %v2098_v44  ;;  %v2091_v59 = vsel %vm2085_vm10, %v2064_v17, %v2080_v20  ;;  %v2099_v22 = vsel %vm2085_vm10, %v2080_v20, %v2064_v17 }
 0x27a   : > { %v2125_v52 = vmul.f32 %v4115_v54, %v2091_v59  ;;  %v2126_v39 = vmul.f32 %v4118_v33, %v2099_v22  ;;  %2581 = vmatmul.mubr.msk.bf16.gmra.mrb[4].mxu1 %vm566_vm7, %v2819_v34 }
 0x27b   : > { %v986_v29 = vpop.permute.xlu0 %985  ;;  %2016 = vmatprep.mubr.bf16.mxu1 %v4394_v26 }
 0x27c   : > { %v2135_v43 = vpack.c.bf16 %v2125_v52, %v2123_v12  ;;  %v988_v23 = vpop.permute.xlu1 %987  ;;  %v2136_v10 = vpack.c.bf16 %v2126_v39, %v2124_v19 }
 0x27e   : > { %2537 = vmatmul.mubr.msk.bf16.gmra.mrb[24].mxu0 %vm566_vm7, %v2820_v36  ;;  %2184 = vmatprep.subr.bf16.mxu1 %v2136_v10 }
 0x27f   : > { %v1002_v58 = vpop.permute.xlu0 %1001  ;;  %2185 = vmatpush1.bf16.msra.mxu1 %v2135_v43  ;;  %946 = vmatprep.mubr.bf16.mxu0 %v4394_v26 }
 0x280   : > { %v2068_v4 = vpop.permute.xlu1 %2067  ;;  %v1012_v21 = vsel %vm1005_vm9, %v986_v29, %v1002_v58  ;;  %v1020_v0 = vsel %vm1005_vm9, %v1002_v58, %v986_v29 }
 0x281   : > { %v1047_v27 = vmul.f32 %v4077_v7, %v1020_v0  ;;  %v1048_v14 = vmul.f32 %v4088_v48, %v1012_v21 }
 0x282   : > { %2582 = vmatmul.mubr.msk.bf16.gmra.mrb[8].mxu1 %vm566_vm7, %v2821_v1 }
 0x283   : > { %v2066_v18 = vpop.permute.xlu0 %2065  ;;  %2026 = vmatprep.mubr.bf16.mxu1 %v4394_v26 }
 0x284   : > { %v1004_v38 = vpop.permute.xlu1 %1003 }
 0x285   : > { %v1013_v35 = vsel %vm1005_vm9, %v988_v23, %v1004_v38  ;;  %v1021_v62 = vsel %vm1005_vm9, %v1004_v38, %v988_v23 }
 0x286   : > { %v1049_v50 = vmul.f32 %v4077_v7, %v1021_v62  ;;  %v1050_v28 = vmul.f32 %v4088_v48, %v1013_v35  ;;  %2538 = vmatmul.mubr.msk.bf16.gmra.mrb[28].mxu0 %vm566_vm7, %v2822_v11 }
 0x287   : > { %v2082_v51 = vpop.permute.xlu0 %2081  ;;  %1132 = vmatprep.mubr.bf16.mxu0 %v4394_v26 }
 0x288   : > { %v1057_v53 = vpack.c.bf16 %v1049_v50, %v1047_v27  ;;  %v2092_v13 = vsel %vm2085_vm10, %v2066_v18, %v2082_v51  ;;  %v2100_v16 = vsel %vm2085_vm10, %v2082_v51, %v2066_v18  ;;  %v2084_v42 = vpop.permute.xlu1 %2083  ;;  %v1058_v61 = vpack.c.bf16 %v1050_v28, %v1048_v14 }
 0x289   : > { %v2127_v49 = vmul.f32 %v4115_v54, %v2092_v13  ;;  %v2128_v7 = vmul.f32 %v4118_v33, %v2100_v16  ;;  %v2093_v48 = vsel %vm2085_vm10, %v2068_v4, %v2084_v42  ;;  %v2101_v40 = vsel %vm2085_vm10, %v2084_v42, %v2068_v4 }
 0x28a   : > { %v2129_v3 = vmul.f32 %v4115_v54, %v2093_v48  ;;  %v2130_v32 = vmul.f32 %v4118_v33, %v2101_v40  ;;  %1106 = vmatprep.subr.bf16.mxu0 %v1058_v61  ;;  %2583 = vmatmul.mubr.msk.bf16.gmra.mrb[12].mxu1 %vm566_vm7, %v2823_v57  ;;  %v2827_v54 = vld [vmem:[#allocation2 + $0x108] sm:$0xff]   ;;  %v2828_v33 = vld [vmem:[#allocation2 + $0x50] sm:$0xff]  }
 0x28b   : > { %1107 = vmatpush1.bf16.msra.mxu0 %v1057_v53  ;;  %2212 = vmatprep.mubr.bf16.mxu1 %v4394_v26 }
 0x28c   : > { %v2137_v55 = vpack.c.bf16 %v2129_v3, %v2127_v49  ;;  %v2138_v37 = vpack.c.bf16 %v2130_v32, %v2128_v7 }
 0x28e   : > { %2544 = vmatmul.mubr.msk.bf16.vlgmr.msra.gmra.mrb[16].mxu0 %vm566_vm7, %v2824_v24  ;;  %2186 = vmatprep.subr.bf16.mxu1 %v2138_v37 }
 0x28f   : > { %2187 = vmatpush1.bf16.msra.mxu1 %v2137_v55  ;;  %1142 = vmatprep.mubr.bf16.mxu0 %v4394_v26 }
 0x292   : > { %2589 = vmatmul.mubr.msk.bf16.vlgmr.msra.gmra.mrb[0].mxu1 %vm566_vm7, %v2825_v63 }
 0x293   : > { %2222 = vmatprep.mubr.bf16.mxu1 %v4394_v26 }
 0x296   : > { %2545 = vmatmul.mubr.msk.bf16.gmra.mrb[20].mxu0 %vm566_vm7, %v2826_v56 }
 0x297   : > { %1152 = vmatprep.mubr.bf16.mxu0 %v4394_v26 }
 0x29a   : > { %2590 = vmatmul.mubr.msk.bf16.gmra.mrb[4].mxu1 %vm566_vm7, %v2827_v54 }
 0x29b   : > { %2232 = vmatprep.mubr.bf16.mxu1 %v4394_v26 }
 0x29e   : > { %2546 = vmatmul.mubr.msk.bf16.gmra.mrb[24].mxu0 %vm566_vm7, %v2828_v33 }
 0x29f   : > { %1162 = vmatprep.mubr.bf16.mxu0 %v4394_v26 }
 0x2a2   : > { %2591 = vmatmul.mubr.msk.bf16.gmra.mrb[8].mxu1 %vm566_vm7, %v2829_v15 }
 0x2a3   : > { %2242 = vmatprep.mubr.bf16.mxu1 %v4394_v26 }
 0x2a6   : > { %2547 = vmatmul.mubr.msk.bf16.gmra.mrb[28].mxu0 %vm566_vm7, %v2830_v9 }
 0x2a7   : > { %2399 = vmatprep.mubr.bf16.mxu0 %v4394_v26  ;;  %v2285_v44 = vpop.permute.xlu1 %2284 }
 0x2a8   : > { %v2280_v46 = vpop.permute.xlu0 %2279 }
 0x2aa   : > { %2592 = vmatmul.mubr.msk.bf16.gmra.mrb[12].mxu1 %vm566_vm7, %v2831_v2 }
 0x2ac   : > { %v2290_v11 = vpop.permute.xlu1 %2289 }
 0x2b0   : > { %v2295_v27 = vpop.permute.xlu0 %2294 }
 0x2b1   : > { %v2300_v24 = vpop.permute.xlu1 %2299 }
 0x2b4   : > { %v2305_v15 = vpop.permute.xlu0 %2304 }
 0x361   : > { %v1134_v6 = vpop.f32.mrb[16].mxu0 }
 0x362   : > { %v1136_v5 = vpop.f32.mrb[17].mxu0 }
 0x363   : > { %v1138_v47 = vpop.f32.mrb[18].mxu0 }
 0x364   : > { %v1140_v8 = vpop.f32.mrb[19].mxu0 }
 0x365   : > { %v2214_v60 = vpop.f32.mrb[0].mxu1 }
 0x366   : > { %v2601_v25 = vadd.f32 %v2214_v60, %v1134_v6  ;;  %v2216_v17 = vpop.f32.mrb[1].mxu1 }
 0x367   : > { %v2602_v41 = vadd.f32 %v2216_v17, %v1136_v5  ;;  %v2218_v45 = vpop.f32.mrb[2].mxu1 }
 0x368   : > { %v2317_v34 = vadd.f32 %v2601_v25, %v2280_v46  ;;  %v2603_v30 = vadd.f32 %v2218_v45, %v1138_v47  ;;  %v2220_v31 = vpop.f32.mrb[3].mxu1 }
 0x369   : > { %v2318_v20 = vadd.f32 %v2602_v41, %v2280_v46  ;;  %v2604_v12 = vadd.f32 %v2220_v31, %v1140_v8  ;;  %v1144_v19 = vpop.f32.mrb[20].mxu0 }
 0x36a   : > { %v2319_v26 = vadd.f32 %v2603_v30, %v2285_v44  ;;  %v1146_v59 = vpop.f32.mrb[21].mxu0  ;;  %v2333_v39 = vmax.f32 %v2317_v34, 0.0 }
 0x36b   : > { %v2320_v22 = vadd.f32 %v2604_v12, %v2285_v44  ;;  %v1148_v52 = vpop.f32.mrb[22].mxu0  ;;  %v2334_v43 = vmax.f32 %v2318_v20, 0.0  ;;  %v2310_v20 = vpop.permute.xlu1 %2309 }
 0x36c   : > { %v2335_v36 = vmax.f32 %v2319_v26, 0.0  ;;  %v1150_v29 = vpop.f32.mrb[23].mxu0 }
 0x36d   : > { %v2336_v23 = vmax.f32 %v2320_v22, 0.0  ;;  %v2224_v10 = vpop.f32.mrb[4].mxu1 }
 0x36e   : > { %v2350_v1 = vpack.c.bf16 %v2335_v36, %v2333_v39  ;;  %v2605_v58 = vadd.f32 %v2224_v10, %v1144_v19  ;;  %v2226_v4 = vpop.f32.mrb[5].mxu1  ;;  %v2315_v39 = vpop.permute.xlu0 %2314 }
 0x36f   : > { %v2606_v21 = vadd.f32 %v2226_v4, %v1146_v59  ;;  %v2228_v0 = vpop.f32.mrb[6].mxu1  ;;  %v2351_v18 = vpack.c.bf16 %v2336_v23, %v2334_v43 }
 0x370   : > { %v2321_v38 = vadd.f32 %v2605_v58, %v2290_v11  ;;  %v2607_v35 = vadd.f32 %v2228_v0, %v1148_v52  ;;  %v2230_v62 = vpop.f32.mrb[7].mxu1  ;;  %v2349_v0 = vld [vmem:[%s4346_s4] sm:$0xf] }
 0x371   : > { %v2322_v14 = vadd.f32 %v2606_v21, %v2290_v11  ;;  %v2608_v50 = vadd.f32 %v2230_v62, %v1150_v29  ;;  %v1154_v28 = vpop.f32.mrb[24].mxu0  ;;  %2367 = vmatprep.subr.bf16.mxu0 %v2351_v18  ;;  %v2362_v18 = vpop.permute.xlu1 %2361 }
 0x372   : > { %v2323_v57 = vadd.f32 %v2607_v35, %v2295_v27  ;;  %v1156_v51 = vpop.f32.mrb[25].mxu0  ;;  %2368 = vmatpush1.bf16.msra.mxu0 %v2350_v1  ;;  %v2337_v16 = vmax.f32 %v2321_v38, 0.0 }
 0x373   : > { %v2324_v53 = vadd.f32 %v2608_v50, %v2295_v27  ;;  %v1158_v13 = vpop.f32.mrb[26].mxu0  ;;  %v2338_v49 = vmax.f32 %v2322_v14, 0.0 }
 0x374   : > { %v2339_v42 = vmax.f32 %v2323_v57, 0.0  ;;  %v1160_v61 = vpop.f32.mrb[27].mxu0 }
 0x375   : > { %v2340_v7 = vmax.f32 %v2324_v53, 0.0  ;;  %v2234_v48 = vpop.f32.mrb[8].mxu1 }
 0x376   : > { %v2352_v40 = vpack.c.bf16 %v2339_v42, %v2337_v16  ;;  %v2609_v3 = vadd.f32 %v2234_v48, %v1154_v28  ;;  %v2236_v32 = vpop.f32.mrb[9].mxu1 }
 0x377   : > { %v2610_v55 = vadd.f32 %v2236_v32, %v1156_v51  ;;  %v2238_v37 = vpop.f32.mrb[10].mxu1  ;;  %v2353_v63 = vpack.c.bf16 %v2340_v7, %v2338_v49 }
 0x378   : > { %v2325_v56 = vadd.f32 %v2609_v3, %v2300_v24  ;;  %v2611_v54 = vadd.f32 %v2238_v37, %v1158_v13  ;;  %v2240_v33 = vpop.f32.mrb[11].mxu1 }
 0x379   : > { %v2326_v9 = vadd.f32 %v2610_v55, %v2300_v24  ;;  %v2612_v2 = vadd.f32 %v2240_v33, %v1160_v61  ;;  %v1164_v6 = vpop.f32.mrb[28].mxu0  ;;  %2369 = vmatprep.subr.bf16.mxu0 %v2353_v63 }
 0x37a   : > { %v2327_v5 = vadd.f32 %v2611_v54, %v2305_v15  ;;  %v1166_v47 = vpop.f32.mrb[29].mxu0  ;;  %2370 = vmatpush1.bf16.msra.mxu0 %v2352_v40  ;;  %v2341_v60 = vmax.f32 %v2325_v56, 0.0 }
 0x37b   : > { %v2328_v8 = vadd.f32 %v2612_v2, %v2305_v15  ;;  %v1168_v46 = vpop.f32.mrb[30].mxu0  ;;  %v2342_v41 = vmax.f32 %v2326_v9, 0.0 }
 0x37c   : > { %v2343_v25 = vmax.f32 %v2327_v5, 0.0  ;;  %v1170_v17 = vpop.f32.mrb[31].mxu0 }
 0x37d   : > { %v2344_v45 = vmax.f32 %v2328_v8, 0.0  ;;  %v2244_v34 = vpop.f32.mrb[12].mxu1 }
 0x37e   : > { %v2354_v30 = vpack.c.bf16 %v2343_v25, %v2341_v60  ;;  %v2613_v31 = vadd.f32 %v2244_v34, %v1164_v6  ;;  %v2246_v44 = vpop.f32.mrb[13].mxu1 }
 0x37f   : > { %v2614_v12 = vadd.f32 %v2246_v44, %v1166_v47  ;;  %v2248_v19 = vpop.f32.mrb[14].mxu1  ;;  %v2355_v26 = vpack.c.bf16 %v2344_v45, %v2342_v41 }
 0x380   : > { %v2329_v59 = vadd.f32 %v2613_v31, %v2310_v20  ;;  %v2615_v22 = vadd.f32 %v2248_v19, %v1168_v46  ;;  %v2250_v52 = vpop.f32.mrb[15].mxu1 }
 0x381   : > { %v2330_v36 = vadd.f32 %v2614_v12, %v2310_v20  ;;  %v2616_v29 = vadd.f32 %v2250_v52, %v1170_v17  ;;  %2371 = vmatprep.subr.bf16.mxu0 %v2355_v26 }
 0x382   : > { %v2331_v43 = vadd.f32 %v2615_v22, %v2315_v39  ;;  %2372 = vmatpush1.bf16.msra.mxu0 %v2354_v30  ;;  %v2345_v10 = vmax.f32 %v2329_v59, 0.0 }
 0x383   : > { %v2332_v23 = vadd.f32 %v2616_v29, %v2315_v39  ;;  %v2346_v58 = vmax.f32 %v2330_v36, 0.0 }
 0x384   : > { %v2347_v1 = vmax.f32 %v2331_v43, 0.0 }
 0x385   : > { %v2348_v4 = vmax.f32 %v2332_v23, 0.0 }
 0x386   : > { %v2356_v11 = vpack.c.bf16 %v2347_v1, %v2345_v10 }
 0x387   : > { %v2357_v21 = vpack.c.bf16 %v2348_v4, %v2346_v58 }
 0x389   : > { %2373 = vmatprep.subr.bf16.mxu0 %v2357_v21 }
 0x38a   : > { %2374 = vmatpush1.bf16.msra.mxu0 %v2356_v11 }
 0x38d   : > { %2593 = vmatmul.mubr.msk.bf16.vlgmr.msra.gmra.mrb[32].mxu0 %vm566_vm7, %v2349_v0 }
 0x460   : > { %v2401_v38 = vpop.f32.mrb[32].mxu0 }
 0x461   : > { %v2402_v35 = vadd.f32 %v2401_v38, %v2362_v18  ;;  %v2403_v62 = vpop.f32.mrb[33].mxu0 }
 0x462   : > { %v2404_v27 = vadd.f32 %v2403_v62, %v2362_v18  ;;  %v2405_v14 = vpop.f32.mrb[34].mxu0 }
 0x463   : > { %2408 = vst [vmem:[%s286_s19] sm:$0xff] %v2402_v35  ;;  %v2406_v50 = vpop.f32.mrb[35].mxu0 }
 0x464   : > { %2409 = vst [vmem:[%s286_s19 + $0x8] sm:$0xff] %v2404_v27 }
 0x465   : > { %2873 = shalt.err (!%p2870_p7)
}
 0x466   : > { %s2874_s17 = scalar_lea.hbm %s4300_s23, 256  ;;  %s2878_s15 = scalar_lea.hbm %s4349_s7, 512 }
 0x467   : > { %p2875_p8 = scmp.ne.s32.totalorder %s4300_s23, %s2874_s17  ;;  %p2879_p1 = scmp.lt.u32.totalorder %s4300_s23, %s4349_s7 }
 0x468   : > { %p2880_p0 = scmp.lt.u32.totalorder %s2878_s15, %s2874_s17  ;;  %p2882_p6 = scmp.lt.u32.totalorder %s2874_s17, %s4300_s23 }
 0x469   : > { %p2876_p11 = pnand %p2875_p8, %p4412_p9 }
 0x46a   : > { %p2881_p5 = por %p2880_p0, %p2879_p1 }
 0x46b   : > { %p2877_p13 = pneg %p2876_p11 }
 0x46c   : > { %p2883_p10 = por %p2882_p6, %p2881_p5 }
 0x46e   : > { %p2884_p12 = pnand %p2883_p10, %p2877_p13 }
 0x470   : > { %2887 = shalt.err (!%p2884_p12)
}
 0x471   : > { %2733 = dma.vmem_to_hbm [thread:$0]  (%p4412_p9), %s4302_s20, 256, %s4300_s23, %s2411_s28  }
 0x472 PF: > { %p2745_p2 = scmp.ge.s32.totalorder %s2926_s27, 2  ;;  %s2437_s21 = sand.u32 1, %s2914_s24  }
 0x473   : > { %p4413_p3 = scmp.ne.s32.totalorder %s4373_s12, 0  ;;  %s2438_s22 = scalar_lea.sflag [#allocation4], %s2437_s21 }
 0x475   : > { %p2740_p4 = pnand %p2745_p2, %p4413_p3 }
 0x477   : > { %2909 = dma.done.wait (!%p2740_p4), %s2438_s22, 256  }
 0x478   : > { %2911 = vsyncadd (!%p2740_p4), %s2438_s22, 4294967040  ;;  %p18_p7 = scmp.ge.s32.totalorder %s3006_s30, 4   ;;  %s4414_s24 = smov %s2918_s25 }
 0x479   : > { %s4415_s25 = smov %s2922_s26  ;;  %s4416_s26 = smov %s3017_s10 }
 0x47a   : > { %s4417_s27 = smov %s3006_s30  ;;  %20 = sbr.rel (!%p18_p7) target bundleno = 4 (0x4), region = 103 }
 0x481   :  { %2443 = vsyncpa [#allocation3], 1 }
 0x482   :  { %2445 = vsyncpa [#allocation3 + $0x1], 1 }
 0x483   :  { %2446 = vsyncpa [#allocation4], 1 }
 0x484   :  { %2448 = vsyncpa [#allocation4 + $0x1], 1 }

</bundles_post_ra>
